<compile_context>
chip_gen: v5e
topology: v5e:2x2
jax: 0.10.0
libtpu: 0.0.40
codegen_flags: <defaults>
</compile_context>

<pallas_src>
import functools

import numpy as np
import jax
import jax.numpy as jnp
from jax.experimental import pallas as pl
from jax.experimental.pallas import tpu as pltpu


def _cnn_kernel(x_ref, bc_ref, wct_ref, w1t_ref, b1_ref, wlt_ref, bl_ref,
                o_ref, *, bt, seq_len):
    S = seq_len
    F = x_ref.shape[-1]
    # (Bt, S, F) -> (Bt*S, F); pure f32 matmul (matches PyTorch precision and
    # is supported on every backend, incl. the interpret/CPU path).
    x2 = x_ref[...].astype(jnp.float32).reshape(bt * S, F)
    z = jnp.dot(x2, wct_ref[...], preferred_element_type=jnp.float32)   # (Bt*S, 2)
    zt = z.T                                                            # (2, Bt*S)
    u = zt[0:1, :]                                                      # tap 0
    v = zt[1:2, :]                                                      # tap 1
    # conv[b, t] = u[b, t] + v[b, t+1]: shift v left by one lane over the
    # flattened (Bt*S) axis.  Wrap-around junk lands at t == S-1 of each row
    # and is explicitly zeroed below (robust to inf/NaN and to unspecified
    # padding of a partial last batch tile).
    v_shift = pltpu.roll(v, bt * S - 1, 1)
    conv_flat = jnp.maximum(u + v_shift + bc_ref[0], 0.0)               # (1, Bt*S)
    conv = conv_flat.reshape(bt, S)                                     # (Bt, S)
    col = jax.lax.broadcasted_iota(jnp.int32, (bt, S), 1)
    conv = jnp.where(col < S - 1, conv, 0.0)                            # kill t == S-1
    h = jnp.dot(conv, w1t_ref[...], preferred_element_type=jnp.float32) + b1_ref[...]
    h = 1.0 / (1.0 + jnp.exp(-h))                                       # sigmoid (f32)
    out = jnp.dot(h, wlt_ref[...], preferred_element_type=jnp.float32) + bl_ref[...]
    o_ref[...] = out.astype(o_ref.dtype)                                # (Bt, out_dim)


def cnn_forward(x, params, *, batch_tile=32):
    """x: (B, 128, 768) f32 (bf16 also accepted; it is upcast in VMEM)."""
    B, S, F = x.shape
    assert S == 128 and F == 768, "implied by Conv1d((2,768)) + Linear(127, d_model)"

    wct = params["conv_w"].reshape(2, F).T.astype(jnp.float32)           # (F, 2)
    bc = params["conv_b"].reshape(1).astype(jnp.float32)                 # (1,) SMEM scalar
    w1 = params["lin1_w"].astype(jnp.float32)                            # (d_model, 127)
    b1 = params["lin1_b"].astype(jnp.float32)
    wl = params["linL_w"].astype(jnp.float32)                            # (out_dim, d_model)
    bl = params["linL_b"].astype(jnp.float32)
    d_model, out_dim = w1.shape[0], wl.shape[0]

    # Zero-pad linear1's transposed weight 127 -> 128 rows (shape pad only;
    # the explicit in-kernel mask already kills seq position 127).
    w1t_pad = jnp.zeros((S, d_model), jnp.float32).at[: S - 1, :].set(w1.T)
    b1r = b1.reshape(1, d_model)
    wlt = wl.T                                                           # (d_model, out_dim)
    blr = bl.reshape(1, out_dim)

    # Batch tiling: Bt rows per grid step; no host-side padding of x — the
    # partial last block (if any) is handled by Pallas' masked edge blocks.
    bt = B if B <= batch_tile else batch_tile
    num_tiles = pl.cdiv(B, bt)

    kernel = functools.partial(_cnn_kernel, bt=bt, seq_len=S)
    out = pl.pallas_call(
        kernel,
        out_shape=jax.ShapeDtypeStruct((B, out_dim), jnp.float32),
        grid=(num_tiles,),
        in_specs=[
            pl.BlockSpec((bt, S, F), lambda i: (i, 0, 0)),               # x tile
            pl.BlockSpec(memory_space=pltpu.MemorySpace.SMEM),           # conv bias
            pl.BlockSpec((F, 2), lambda i: (0, 0)),                      # conv weight^T
            pl.BlockSpec((S, d_model), lambda i: (0, 0)),                # w1^T (zero-padded)
            pl.BlockSpec((1, d_model), lambda i: (0, 0)),                # b1
            pl.BlockSpec((d_model, out_dim), lambda i: (0, 0)),          # wl^T
            pl.BlockSpec((1, out_dim), lambda i: (0, 0)),                # bl
        ],
        out_specs=pl.BlockSpec((bt, out_dim), lambda i: (i, 0)),
        compiler_params=pltpu.CompilerParams(
            dimension_semantics=("parallel",),
            vmem_limit_bytes=48 * 1024 * 1024,
        ),
    )(x, bc, wct, w1t_pad, b1r, wlt, blr)
    return out


def reference_numpy(x, params):
    x = np.asarray(x, np.float64)
    wc = np.asarray(params["conv_w"], np.float64).reshape(2, x.shape[-1])
    bc = float(np.asarray(params["conv_b"], np.float64)[0])
    w1 = np.asarray(params["lin1_w"], np.float64)
    b1 = np.asarray(params["lin1_b"], np.float64)
    wl = np.asarray(params["linL_w"], np.float64)
    bl = np.asarray(params["linL_b"], np.float64)
    u = x @ wc[0]                                         # (B, S)
    v = x @ wc[1]                                         # (B, S)
    conv = np.maximum(u[:, :-1] + v[:, 1:] + bc, 0.0)     # (B, 127)
    h = 1.0 / (1.0 + np.exp(-(conv @ w1.T + b1)))
    return h @ wl.T + bl


if __name__ == "__main__":
    # seq_len / feature dim are pinned by the module (Conv1d((2,768)) + Linear(127, .)).
    B, SEQ_LEN, FEAT = 2, 128, 768
    D_MODEL, OUTPUT_DIM = 32, 8

    key = jax.random.PRNGKey(0)
    kx, k0, k1, k2, k3, k4, k5 = jax.random.split(key, 7)

    def uinit(k, shape, fan_in):
        bound = 1.0 / np.sqrt(fan_in)
        return jax.random.uniform(k, shape, jnp.float32, -bound, bound)

    params = {
        "conv_w": uinit(k0, (1, 1, 2, FEAT), 2 * FEAT),            # Conv1d(1,1,(2,768)).weight
        "conv_b": uinit(k1, (1,), 2 * FEAT),                       # Conv1d bias
        "lin1_w": uinit(k2, (D_MODEL, SEQ_LEN - 1), SEQ_LEN - 1),  # Linear(127, d_model)
        "lin1_b": uinit(k3, (D_MODEL,), SEQ_LEN - 1),
        "linL_w": uinit(k4, (OUTPUT_DIM, D_MODEL), D_MODEL),       # Linear(d_model, output_dim)
        "linL_b": uinit(k5, (OUTPUT_DIM,), D_MODEL),
    }

    # Small primary check (single tile).
    x = jax.random.normal(kx, (B, SEQ_LEN, FEAT), jnp.float32)
    out = jax.block_until_ready(cnn_forward(x, params))
    np.testing.assert_allclose(np.asarray(out), reference_numpy(x, params),
                               rtol=5e-3, atol=5e-3)

    # Exercise the batch-tiled path with a ragged last block (grid=3, 2 valid
    # rows in the final tile) — no host-side padding copy.
    xb = jax.random.normal(jax.random.PRNGKey(1), (18, SEQ_LEN, FEAT), jnp.float32)
    outb = jax.block_until_ready(cnn_forward(xb, params, batch_tile=8))
    np.testing.assert_allclose(np.asarray(outb), reference_numpy(xb, params),
                               rtol=5e-3, atol=5e-3)

    print("KERNEL_OK")
</pallas_src>

<mosaic_0001>
module attributes {stable_mosaic.version = 11 : i64} {
  func.func @_cnn_kernel(%arg0: i32, %arg1: memref<2x128x768xf32, #tpu.memory_space<vmem>>, %arg2: memref<1xf32, #tpu.memory_space<smem>>, %arg3: memref<768x2xf32, #tpu.memory_space<vmem>>, %arg4: memref<128x32xf32, #tpu.memory_space<vmem>>, %arg5: memref<1x32xf32, #tpu.memory_space<vmem>>, %arg6: memref<32x8xf32, #tpu.memory_space<vmem>>, %arg7: memref<1x8xf32, #tpu.memory_space<vmem>>, %arg8: memref<2x8xf32, #tpu.memory_space<vmem>>) attributes {dimension_semantics = [#tpu.dimension_semantics<parallel>], iteration_bounds = array<i64: 1>, scalar_prefetch = 0 : i64, scratch_operands = 0 : i64, tpu.core_type = #tpu.core_type<tc>, window_params = [{transform_indices = @transform_0, window_bounds = array<i64: 2, 128, 768>}, {transform_indices = @transform_1, window_bounds = array<i64: 1>}, {pipeline_mode = #tpu.pipeline_mode<synchronous>, transform_indices = @transform_2, window_bounds = array<i64: 768, 2>}, {pipeline_mode = #tpu.pipeline_mode<synchronous>, transform_indices = @transform_3, window_bounds = array<i64: 128, 32>}, {pipeline_mode = #tpu.pipeline_mode<synchronous>, transform_indices = @transform_4, window_bounds = array<i64: 1, 32>}, {pipeline_mode = #tpu.pipeline_mode<synchronous>, transform_indices = @transform_5, window_bounds = array<i64: 32, 8>}, {pipeline_mode = #tpu.pipeline_mode<synchronous>, transform_indices = @transform_6, window_bounds = array<i64: 1, 8>}, {transform_indices = @transform_7, window_bounds = array<i64: 2, 8>}]} {
    %c0 = arith.constant 0 : index
    %c0_0 = arith.constant 0 : index
    %c0_1 = arith.constant 0 : index
    %0 = vector.load %arg1[%c0, %c0_0, %c0_1] : memref<2x128x768xf32, #tpu.memory_space<vmem>>, vector<2x128x768xf32>
    %1 = vector.shape_cast %0 : vector<2x128x768xf32> to vector<256x768xf32>
    %c0_2 = arith.constant 0 : index
    %c0_3 = arith.constant 0 : index
    %2 = vector.load %arg3[%c0_2, %c0_3] : memref<768x2xf32, #tpu.memory_space<vmem>>, vector<768x2xf32>
    %cst = arith.constant dense<0.000000e+00> : vector<256x2xf32>
    %3 = tpu.matmul %1, %2, %cst {dimension_numbers = #tpu.dot_dimension_numbers<[1], [0], [0], [1], [0, 0, 1, 1], [], []>} : vector<256x768xf32>, vector<768x2xf32>, vector<256x2xf32> -> vector<256x2xf32>
    %4 = tpu.transpose %3, [1, 0] : vector<256x2xf32> -> vector<2x256xf32>
    %5 = vector.extract_strided_slice %4 {offsets = [0, 0], sizes = [1, 256], strides = [1, 1]} : vector<2x256xf32> to vector<1x256xf32>
    %6 = vector.extract_strided_slice %4 {offsets = [1, 0], sizes = [1, 256], strides = [1, 1]} : vector<2x256xf32> to vector<1x256xf32>
    %c255_i32 = arith.constant 255 : i32
    %7 = tpu.dynamic_rotate %6 by %c255_i32 dim 1 : vector<1x256xf32>, i32 -> vector<1x256xf32>
    %8 = arith.addf %5, %7 : vector<1x256xf32>
    %c0_4 = arith.constant 0 : index
    %9 = memref.load %arg2[%c0_4] : memref<1xf32, #tpu.memory_space<smem>>
    %10 = vector.broadcast %9 : f32 to vector<1x256xf32>
    %11 = arith.addf %8, %10 : vector<1x256xf32>
    %cst_5 = arith.constant 0.000000e+00 : f32
    %12 = vector.broadcast %cst_5 : f32 to vector<1x256xf32>
    %13 = arith.maximumf %11, %12 : vector<1x256xf32>
    %14 = vector.shape_cast %13 : vector<1x256xf32> to vector<2x128xf32>
    %15 = tpu.iota {dimensions = array<i32: 1>} : vector<2x128xi32>
    %c127_i32 = arith.constant 127 : i32
    %16 = vector.broadcast %c127_i32 : i32 to vector<2x128xi32>
    %17 = arith.cmpi slt, %15, %16 : vector<2x128xi32>
    %cst_6 = arith.constant 0.000000e+00 : f32
    %18 = vector.broadcast %cst_6 : f32 to vector<2x128xf32>
    %19 = arith.select %17, %14, %18 : vector<2x128xi1>, vector<2x128xf32>
    %c0_7 = arith.constant 0 : index
    %c0_8 = arith.constant 0 : index
    %20 = vector.load %arg4[%c0_7, %c0_8] : memref<128x32xf32, #tpu.memory_space<vmem>>, vector<128x32xf32>
    %cst_9 = arith.constant dense<0.000000e+00> : vector<2x32xf32>
    %21 = tpu.matmul %19, %20, %cst_9 {dimension_numbers = #tpu.dot_dimension_numbers<[1], [0], [0], [1], [0, 0, 1, 1], [], []>} : vector<2x128xf32>, vector<128x32xf32>, vector<2x32xf32> -> vector<2x32xf32>
    %c0_10 = arith.constant 0 : index
    %c0_11 = arith.constant 0 : index
    %22 = vector.load %arg5[%c0_10, %c0_11] : memref<1x32xf32, #tpu.memory_space<vmem>>, vector<1x32xf32>
    %23 = vector.broadcast %22 : vector<1x32xf32> to vector<2x32xf32>
    %24 = arith.addf %21, %23 : vector<2x32xf32>
    %cst_12 = arith.constant 0.000000e+00 : f32
    %25 = vector.broadcast %cst_12 : f32 to vector<2x32xf32>
    %26 = arith.subf %25, %24 : vector<2x32xf32>
    %27 = math.exp %26 : vector<2x32xf32>
    %cst_13 = arith.constant 1.000000e+00 : f32
    %28 = vector.broadcast %cst_13 : f32 to vector<2x32xf32>
    %29 = arith.addf %28, %27 : vector<2x32xf32>
    %cst_14 = arith.constant 1.000000e+00 : f32
    %30 = vector.broadcast %cst_14 : f32 to vector<2x32xf32>
    %31 = arith.divf %30, %29 : vector<2x32xf32>
    %c0_15 = arith.constant 0 : index
    %c0_16 = arith.constant 0 : index
    %32 = vector.load %arg6[%c0_15, %c0_16] : memref<32x8xf32, #tpu.memory_space<vmem>>, vector<32x8xf32>
    %cst_17 = arith.constant dense<0.000000e+00> : vector<2x8xf32>
    %33 = tpu.matmul %31, %32, %cst_17 {dimension_numbers = #tpu.dot_dimension_numbers<[1], [0], [0], [1], [0, 0, 1, 1], [], []>} : vector<2x32xf32>, vector<32x8xf32>, vector<2x8xf32> -> vector<2x8xf32>
    %c0_18 = arith.constant 0 : index
    %c0_19 = arith.constant 0 : index
    %34 = vector.load %arg7[%c0_18, %c0_19] : memref<1x8xf32, #tpu.memory_space<vmem>>, vector<1x8xf32>
    %35 = vector.broadcast %34 : vector<1x8xf32> to vector<2x8xf32>
    %36 = arith.addf %33, %35 : vector<2x8xf32>
    %c0_20 = arith.constant 0 : index
    %c0_21 = arith.constant 0 : index
    %37 = vector.load %arg8[%c0_20, %c0_21] : memref<2x8xf32, #tpu.memory_space<vmem>>, vector<2x8xf32>
    tpu.vector_store %arg8[%c0_20, %c0_21], %36 {strides = array<i32>} : memref<2x8xf32, #tpu.memory_space<vmem>>, vector<2x8xf32>,
    return
  }
  func.func @transform_0(%arg0: i32) -> (i32, i32, i32) {
    %c0_i32 = arith.constant 0 : i32
    %c0_i32_0 = arith.constant 0 : i32
    %c0_i32_1 = arith.constant 0 : i32
    return %arg0, %c0_i32, %c0_i32_0 : i32, i32, i32
  }
  func.func @transform_1(%arg0: i32) -> i32 {
    %c0_i32 = arith.constant 0 : i32
    %c0_i32_0 = arith.constant 0 : i32
    return %c0_i32 : i32
  }
  func.func @transform_2(%arg0: i32) -> (i32, i32) {
    %c0_i32 = arith.constant 0 : i32
    %c0_i32_0 = arith.constant 0 : i32
    %c0_i32_1 = arith.constant 0 : i32
    return %c0_i32, %c0_i32_0 : i32, i32
  }
  func.func @transform_3(%arg0: i32) -> (i32, i32) {
    %c0_i32 = arith.constant 0 : i32
    %c0_i32_0 = arith.constant 0 : i32
    %c0_i32_1 = arith.constant 0 : i32
    return %c0_i32, %c0_i32_0 : i32, i32
  }
  func.func @transform_4(%arg0: i32) -> (i32, i32) {
    %c0_i32 = arith.constant 0 : i32
    %c0_i32_0 = arith.constant 0 : i32
    %c0_i32_1 = arith.constant 0 : i32
    return %c0_i32, %c0_i32_0 : i32, i32
  }
  func.func @transform_5(%arg0: i32) -> (i32, i32) {
    %c0_i32 = arith.constant 0 : i32
    %c0_i32_0 = arith.constant 0 : i32
    %c0_i32_1 = arith.constant 0 : i32
    return %c0_i32, %c0_i32_0 : i32, i32
  }
  func.func @transform_6(%arg0: i32) -> (i32, i32) {
    %c0_i32 = arith.constant 0 : i32
    %c0_i32_0 = arith.constant 0 : i32
    %c0_i32_1 = arith.constant 0 : i32
    return %c0_i32, %c0_i32_0 : i32, i32
  }
  func.func @transform_7(%arg0: i32) -> (i32, i32) {
    %c0_i32 = arith.constant 0 : i32
    %c0_i32_0 = arith.constant 0 : i32
    return %arg0, %c0_i32 : i32, i32
  }
}

</mosaic_0001>

<bundles_post_ra>
// kernel: tpu_custom_call.1
= control target key start
LH: loop header
LB: loop body
LE: loop exit
PB: predicated region body
PF: predicated region fallthrough
CT: control target
= control target key end

     0   :  { %13 = vsyncpa [#allocation4], 0  ;;  %s1881_s0 = inlined_call_operand.hbm [shape: f32[2,128,768], index: 0, kind: input, shape index: {}]   ;;  %s1882_s1 = inlined_call_operand.<no memory space> [shape: f32[1], index: 1, kind: input, shape index: {}]   ;;  %s1883_s2 = inlined_call_operand.vmem [shape: f32[768,2], index: 2, kind: input, shape index: {}]   ;;  %s1884_s3 = inlined_call_operand.vmem [shape: f32[128,32], index: 3, kind: input, shape index: {}]   ;;  %s1885_s4 = inlined_call_operand.vmem [shape: f32[1,32], index: 4, kind: input, shape index: {}]   ;;  %s1886_s5 = inlined_call_operand.vmem [shape: f32[32,8], index: 5, kind: input, shape index: {}]   ;;  %s1887_s6 = inlined_call_operand.vmem [shape: f32[1,8], index: 6, kind: input, shape index: {}]   ;;  %s1888_s7 = inlined_call_operand.hbm [shape: f32[2,8], index: 7, kind: output, shape index: {}]  }
   0x1   :  { %14 = vsyncpa [#allocation5], 0  ;;  %s19_s26 = sshll.u32 %s1881_s0, 4  ;;  %s1316_s27 = smov [#allocation3]   ;;  %s20_s26 = int_to_ptr.hbm [resolvable:$true] %s19_s26 }
   0x2   :  { %s21_s28 = sshll.u32 %s1316_s27, 4  ;;  %s1317_s29 = smov 768   ;;  %s22_s28 = int_to_ptr.vmem [resolvable:$true] %s21_s28 }
   0x3   :  { %s1318_s30 = smov 48  }
   0x4   :  { %27 = dma.hbm_to_vmem [thread:$0]  %s20_s26, 24576, %s22_s28, [#allocation4], %s1317_s29, %s1317_s29, %s1318_s30  }
   0x5   :  { %1312 = dma.done.wait [#allocation4], 24576  }
   0x6   :  { %1313 = vsyncadd [#allocation4], 4294942720  ;;  %v251_v0 = vld [vmem:[%s1883_s2 + $0x78] sm:$0xff]  ;;  %v250_v2 = vld [vmem:[%s1883_s2 + $0x70] sm:$0xff]  ;;  %s1319_s26 = smov 127   ;;  %vm1100_vm1 = vcmask 1043456  }
   0x7   :  { %v267_v1 = vld [vmem:[%s1883_s2 + $0xf8] sm:$0xff]  ;;  %332 = vmatpush.msra.mxu0 %v251_v0  ;;  %1220 = vmatpush.msra.mxu2 %v251_v0  ;;  %v266_v3 = vld [vmem:[%s1883_s2 + $0xf0] sm:$0xff]  ;;  %v249_v4 = vld [vmem:[%s1883_s2 + $0x68] sm:$0xff]  ;;  %vm1175_vm5 = vcmask 261120   ;;  %s1321_s24 = smov [#allocation6]   ;;  %s1208_s28 = sshll.u32 %s1888_s7, 4  ;;  %s1209_s28 = int_to_ptr.hbm [resolvable:$true] %s1208_s28 }
   0x8   :  { %445 = vmatpush.msra.mxu1 %v267_v1  ;;  %1236 = vmatpush.msra.mxu3 %v267_v1  ;;  %v265_v5 = vld [vmem:[%s1883_s2 + $0xe8] sm:$0xff]  ;;  %v248_v6 = vld [vmem:[%s1883_s2 + $0x60] sm:$0xff]  ;;  %v247_v8 = vld [vmem:[%s1883_s2 + $0x58] sm:$0xff]  ;;  %s1206_s25 = sshll.u32 %s1321_s24, 4  ;;  %vm1199_vm7 = vcmask 58368   ;;  %s1207_s25 = int_to_ptr.vmem [resolvable:$true] %s1206_s25 }
   0x9   :  { %333 = vmatpush.msra.mxu0 %v250_v2  ;;  %1221 = vmatpush.msra.mxu2 %v250_v2  ;;  %v264_v7 = vld [vmem:[%s1883_s2 + $0xe0] sm:$0xff]  ;;  %v263_v9 = vld [vmem:[%s1883_s2 + $0xd8] sm:$0xff]  ;;  %v246_v10 = vld [vmem:[%s1883_s2 + $0x50] sm:$0xff] }
   0xa   :  { %446 = vmatpush.msra.mxu1 %v266_v3  ;;  %1237 = vmatpush.msra.mxu3 %v266_v3  ;;  %v262_v11 = vld [vmem:[%s1883_s2 + $0xd0] sm:$0xff]  ;;  %v245_v12 = vld [vmem:[%s1883_s2 + $0x48] sm:$0xff]  ;;  %v244_v14 = vld [vmem:[%s1883_s2 + $0x40] sm:$0xff] }
   0xb   :  { %334 = vmatpush.msra.mxu0 %v249_v4  ;;  %1222 = vmatpush.msra.mxu2 %v249_v4  ;;  %v261_v13 = vld [vmem:[%s1883_s2 + $0xc8] sm:$0xff]  ;;  %v260_v15 = vld [vmem:[%s1883_s2 + $0xc0] sm:$0xff]  ;;  %v243_v16 = vld [vmem:[%s1883_s2 + $0x38] sm:$0xff] }
   0xc   :  { %447 = vmatpush.msra.mxu1 %v265_v5  ;;  %1238 = vmatpush.msra.mxu3 %v265_v5  ;;  %v259_v17 = vld [vmem:[%s1883_s2 + $0xb8] sm:$0xff]  ;;  %v242_v18 = vld [vmem:[%s1883_s2 + $0x30] sm:$0xff]  ;;  %v241_v20 = vld [vmem:[%s1883_s2 + $0x28] sm:$0xff] }
   0xd   :  { %335 = vmatpush.msra.mxu0 %v248_v6  ;;  %1223 = vmatpush.msra.mxu2 %v248_v6  ;;  %v258_v19 = vld [vmem:[%s1883_s2 + $0xb0] sm:$0xff]  ;;  %v257_v21 = vld [vmem:[%s1883_s2 + $0xa8] sm:$0xff]  ;;  %v240_v22 = vld [vmem:[%s1883_s2 + $0x20] sm:$0xff] }
   0xe   :  { %448 = vmatpush.msra.mxu1 %v264_v7  ;;  %1239 = vmatpush.msra.mxu3 %v264_v7  ;;  %v256_v23 = vld [vmem:[%s1883_s2 + $0xa0] sm:$0xff]  ;;  %v239_v24 = vld [vmem:[%s1883_s2 + $0x18] sm:$0xff]  ;;  %v238_v26 = vld [vmem:[%s1883_s2 + $0x10] sm:$0xff] }
   0xf   :  { %336 = vmatpush.msra.mxu0 %v247_v8  ;;  %1224 = vmatpush.msra.mxu2 %v247_v8  ;;  %v255_v25 = vld [vmem:[%s1883_s2 + $0x98] sm:$0xff]  ;;  %v254_v27 = vld [vmem:[%s1883_s2 + $0x90] sm:$0xff]  ;;  %v237_v28 = vld [vmem:[%s1883_s2 + $0x8] sm:$0xff] }
  0x10   :  { %449 = vmatpush.msra.mxu1 %v263_v9  ;;  %1240 = vmatpush.msra.mxu3 %v263_v9  ;;  %v253_v29 = vld [vmem:[%s1883_s2 + $0x88] sm:$0xff]  ;;  %v236_v30 = vld [vmem:[%s1883_s2] sm:$0xff]  ;;  %v146_v33 = vld [vmem:[#allocation3 + $0x330] sm:$0xff] }
  0x11   :  { %337 = vmatpush.msra.mxu0 %v246_v10  ;;  %1225 = vmatpush.msra.mxu2 %v246_v10  ;;  %v252_v31 = vld [vmem:[%s1883_s2 + $0x80] sm:$0xff]  ;;  %v45_v34 = vld [vmem:[#allocation3 + $0x8] sm:$0xff]  ;;  %v315_v35 = vld [vmem:[%s1883_s2 + $0x278] sm:$0xff] }
  0x12   :  { %450 = vmatpush.msra.mxu1 %v262_v11  ;;  %1241 = vmatpush.msra.mxu3 %v262_v11  ;;  %v44_v32 = vld [vmem:[#allocation3] sm:$0xff]  ;;  %v147_v36 = vld [vmem:[#allocation3 + $0x338] sm:$0xff]  ;;  %v314_v40 = vld [vmem:[%s1883_s2 + $0x270] sm:$0xff] }
  0x13   :  { %338 = vmatpush.msra.mxu0 %v245_v12  ;;  %1226 = vmatpush.msra.mxu2 %v245_v12  ;;  %v331_v37 = vld [vmem:[%s1883_s2 + $0x2f8] sm:$0xff]  ;;  %v330_v41 = vld [vmem:[%s1883_s2 + $0x2f0] sm:$0xff]  ;;  %v313_v44 = vld [vmem:[%s1883_s2 + $0x268] sm:$0xff] }
  0x14   :  { %451 = vmatpush.msra.mxu1 %v261_v13  ;;  %1242 = vmatpush.msra.mxu3 %v261_v13  ;;  %v283_v38 = vld [vmem:[%s1883_s2 + $0x178] sm:$0xff]  ;;  %v282_v42 = vld [vmem:[%s1883_s2 + $0x170] sm:$0xff]  ;;  %v329_v45 = vld [vmem:[%s1883_s2 + $0x2e8] sm:$0xff] }
  0x15   :  { %339 = vmatpush.msra.mxu0 %v244_v14  ;;  %1227 = vmatpush.msra.mxu2 %v244_v14  ;;  %v299_v39 = vld [vmem:[%s1883_s2 + $0x1f8] sm:$0xff]  ;;  %v298_v43 = vld [vmem:[%s1883_s2 + $0x1f0] sm:$0xff]  ;;  %v281_v47 = vld [vmem:[%s1883_s2 + $0x168] sm:$0xff] }
  0x16   :  { %452 = vmatpush.msra.mxu1 %v260_v15  ;;  %1243 = vmatpush.msra.mxu3 %v260_v15  ;;  %v50_v46 = vld [vmem:[#allocation3 + $0x30] sm:$0xff]  ;;  %v152_v48 = vld [vmem:[#allocation3 + $0x360] sm:$0xff]  ;;  %v51_v49 = vld [vmem:[#allocation3 + $0x38] sm:$0xff] }
  0x17   :  { %340 = vmatpush.msra.mxu0 %v243_v16  ;;  %1228 = vmatpush.msra.mxu2 %v243_v16  ;;  %v297_v50 = vld [vmem:[%s1883_s2 + $0x1e8] sm:$0xff]  ;;  %v312_v51 = vld [vmem:[%s1883_s2 + $0x260] sm:$0xff]  ;;  %v311_v56 = vld [vmem:[%s1883_s2 + $0x258] sm:$0xff] }
  0x18   :  { %453 = vmatpush.msra.mxu1 %v259_v17  ;;  %1244 = vmatpush.msra.mxu3 %v259_v17  ;;  %v153_v52 = vld [vmem:[#allocation3 + $0x368] sm:$0xff]  ;;  %v328_v53 = vld [vmem:[%s1883_s2 + $0x2e0] sm:$0xff]  ;;  %v327_v57 = vld [vmem:[%s1883_s2 + $0x2d8] sm:$0xff] }
  0x19   :  { %341 = vmatpush.msra.mxu0 %v242_v18  ;;  %1229 = vmatpush.msra.mxu2 %v242_v18  ;;  %v280_v54 = vld [vmem:[%s1883_s2 + $0x160] sm:$0xff]  ;;  %v279_v58 = vld [vmem:[%s1883_s2 + $0x158] sm:$0xff]  ;;  %v310_v60 = vld [vmem:[%s1883_s2 + $0x250] sm:$0xff] }
  0x1a   :  { %454 = vmatpush.msra.mxu1 %v258_v19  ;;  %1245 = vmatpush.msra.mxu3 %v258_v19  ;;  %v296_v55 = vld [vmem:[%s1883_s2 + $0x1e0] sm:$0xff]  ;;  %v295_v59 = vld [vmem:[%s1883_s2 + $0x1d8] sm:$0xff]  ;;  %v326_v61 = vld [vmem:[%s1883_s2 + $0x2d0] sm:$0xff] }
  0x1b   :  { %342 = vmatpush.msra.mxu0 %v241_v20  ;;  %1230 = vmatpush.msra.mxu2 %v241_v20  ;;  %v56_v62 = vld [vmem:[#allocation3 + $0x60] sm:$0xff]  ;;  %v278_v63 = vld [vmem:[%s1883_s2 + $0x150] sm:$0xff]  ;;  %v57_v1 = vld [vmem:[#allocation3 + $0x68] sm:$0xff] }
  0x1c   :  { %455 = vmatpush.msra.mxu1 %v257_v21  ;;  %1246 = vmatpush.msra.mxu3 %v257_v21  ;;  %v158_v0 = vld [vmem:[#allocation3 + $0x390] sm:$0xff]  ;;  %v159_v3 = vld [vmem:[#allocation3 + $0x398] sm:$0xff]  ;;  %v277_v4 = vld [vmem:[%s1883_s2 + $0x148] sm:$0xff] }
  0x1d   :  { %343 = vmatpush.msra.mxu0 %v240_v22  ;;  %1231 = vmatpush.msra.mxu2 %v240_v22  ;;  %v294_v2 = vld [vmem:[%s1883_s2 + $0x1d0] sm:$0xff]  ;;  %v309_v5 = vld [vmem:[%s1883_s2 + $0x248] sm:$0xff]  ;;  %v164_v9 = vld [vmem:[#allocation3 + $0x3c0] sm:$0xff] }
  0x1e   :  { %456 = vmatpush.msra.mxu1 %v256_v23  ;;  %1247 = vmatpush.msra.mxu3 %v256_v23  ;;  %v293_v6 = vld [vmem:[%s1883_s2 + $0x1c8] sm:$0xff]  ;;  %v62_v8 = vld [vmem:[#allocation3 + $0x90] sm:$0xff]  ;;  %v63_v10 = vld [vmem:[#allocation3 + $0x98] sm:$0xff] }
  0x1f   :  { %344 = vmatpush.msra.mxu0 %v239_v24  ;;  %1232 = vmatpush.msra.mxu2 %v239_v24  ;;  %v325_v7 = vld [vmem:[%s1883_s2 + $0x2c8] sm:$0xff]  ;;  %v276_v12 = vld [vmem:[%s1883_s2 + $0x140] sm:$0xff]  ;;  %v170_v17 = vld [vmem:[#allocation3 + $0x3f0] sm:$0xff] }
  0x20   :  { %457 = vmatpush.msra.mxu1 %v255_v25  ;;  %1248 = vmatpush.msra.mxu3 %v255_v25  ;;  %v165_v11 = vld [vmem:[#allocation3 + $0x3c8] sm:$0xff]  ;;  %v308_v13 = vld [vmem:[%s1883_s2 + $0x240] sm:$0xff]  ;;  %v171_v19 = vld [vmem:[#allocation3 + $0x3f8] sm:$0xff] }
  0x21   :  { %345 = vmatpush.msra.mxu0 %v238_v26  ;;  %1233 = vmatpush.msra.mxu2 %v238_v26  ;;  %v292_v14 = vld [vmem:[%s1883_s2 + $0x1c0] sm:$0xff]  ;;  %v69_v18 = vld [vmem:[#allocation3 + $0xc8] sm:$0xff]  ;;  %v275_v20 = vld [vmem:[%s1883_s2 + $0x138] sm:$0xff] }
  0x22   :  { %458 = vmatpush.msra.mxu1 %v254_v27  ;;  %1249 = vmatpush.msra.mxu3 %v254_v27  ;;  %v324_v15 = vld [vmem:[%s1883_s2 + $0x2c0] sm:$0xff]  ;;  %v291_v21 = vld [vmem:[%s1883_s2 + $0x1b8] sm:$0xff]  ;;  %v74_v24 = vld [vmem:[#allocation3 + $0xf0] sm:$0xff] }
  0x23   :  { %346 = vmatpush.msra.mxu0 %v237_v28  ;;  %1234 = vmatpush.msra.mxu2 %v237_v28  ;;  %v68_v16 = vld [vmem:[#allocation3 + $0xc0] sm:$0xff]  ;;  %v307_v22 = vld [vmem:[%s1883_s2 + $0x238] sm:$0xff]  ;;  %v177_v27 = vld [vmem:[#allocation3 + $0x428] sm:$0xff] }
  0x24   :  { %459 = vmatpush.msra.mxu1 %v253_v29  ;;  %1250 = vmatpush.msra.mxu3 %v253_v29  ;;  %v323_v23 = vld [vmem:[%s1883_s2 + $0x2b8] sm:$0xff]  ;;  %v176_v25 = vld [vmem:[#allocation3 + $0x420] sm:$0xff]  ;;  %v274_v28 = vld [vmem:[%s1883_s2 + $0x130] sm:$0xff] }
  0x25   :  { %347 = vmatpush.msra.mxu0 %v236_v30  ;;  %1235 = vmatpush.msra.mxu2 %v236_v30  ;;  %v75_v26 = vld [vmem:[#allocation3 + $0xf8] sm:$0xff]  ;;  %v290_v29 = vld [vmem:[%s1883_s2 + $0x1b0] sm:$0xff] }
  0x26   :  { %460 = vmatpush.msra.mxu1 %v252_v31  ;;  %348 = vmatmul.f32.vlgmr.msra.gmra.mxu0 %v44_v32  ;;  %v306_v30 = vld [vmem:[%s1883_s2 + $0x230] sm:$0xff]  ;;  %v80_v32 = vld [vmem:[#allocation3 + $0x120] sm:$0xff] }
  0x27   :  { %399 = vmatmul.f32.vlgmr.msra.gmra.mxu2 %v146_v33  ;;  %461 = vmatmul.f32.vlgmr.msra.gmra.mxu1 %v45_v34  ;;  %v182_v33 = vld [vmem:[#allocation3 + $0x450] sm:$0xff]  ;;  %v81_v34 = vld [vmem:[#allocation3 + $0x128] sm:$0xff] }
  0x28   :  { %784 = vmatpush.msrb.mxu0 %v315_v35  ;;  %1251 = vmatpush.msra.mxu3 %v252_v31  ;;  %v322_v31 = vld [vmem:[%s1883_s2 + $0x2b0] sm:$0xff]  ;;  %v183_v35 = vld [vmem:[#allocation3 + $0x458] sm:$0xff] }
  0x29   :  { %512 = vmatmul.f32.vlgmr.msra.gmra.mxu3 %v147_v36  ;;  %897 = vmatpush.msrb.mxu1 %v331_v37  ;;  %v273_v36 = vld [vmem:[%s1883_s2 + $0x128] sm:$0xff] }
  0x2a   :  { %558 = vmatpush.msrb.mxu2 %v283_v38  ;;  %671 = vmatpush.msrb.mxu3 %v299_v39  ;;  %v289_v37 = vld [vmem:[%s1883_s2 + $0x1a8] sm:$0xff] }
  0x2b   :  { %785 = vmatpush.msrb.mxu0 %v314_v40  ;;  %898 = vmatpush.msrb.mxu1 %v330_v41  ;;  %v305_v38 = vld [vmem:[%s1883_s2 + $0x228] sm:$0xff]  ;;  %v86_v40 = vld [vmem:[#allocation3 + $0x150] sm:$0xff]  ;;  %v188_v41 = vld [vmem:[#allocation3 + $0x480] sm:$0xff] }
  0x2c   :  { %559 = vmatpush.msrb.mxu2 %v282_v42  ;;  %672 = vmatpush.msrb.mxu3 %v298_v43  ;;  %v321_v39 = vld [vmem:[%s1883_s2 + $0x2a8] sm:$0xff]  ;;  %v87_v42 = vld [vmem:[#allocation3 + $0x158] sm:$0xff] }
  0x2d   :  { %786 = vmatpush.msrb.mxu0 %v313_v44  ;;  %899 = vmatpush.msrb.mxu1 %v329_v45  ;;  %v189_v43 = vld [vmem:[#allocation3 + $0x488] sm:$0xff]  ;;  %v272_v44 = vld [vmem:[%s1883_s2 + $0x120] sm:$0xff] }
  0x2e   :  { %351 = vmatmul.f32.gmra.mxu0 %v50_v46  ;;  %560 = vmatpush.msrb.mxu2 %v281_v47  ;;  %v288_v45 = vld [vmem:[%s1883_s2 + $0x1a0] sm:$0xff] }
  0x2f   :  { %402 = vmatmul.f32.gmra.mxu2 %v152_v48  ;;  %464 = vmatmul.f32.gmra.mxu1 %v51_v49  ;;  %v304_v46 = vld [vmem:[%s1883_s2 + $0x220] sm:$0xff]  ;;  %v194_v48 = vld [vmem:[#allocation3 + $0x4b0] sm:$0xff]  ;;  %v93_v49 = vld [vmem:[#allocation3 + $0x188] sm:$0xff] }
  0x30   :  { %673 = vmatpush.msrb.mxu3 %v297_v50  ;;  %787 = vmatpush.msrb.mxu0 %v312_v51  ;;  %v92_v47 = vld [vmem:[#allocation3 + $0x180] sm:$0xff]  ;;  %v195_v50 = vld [vmem:[#allocation3 + $0x4b8] sm:$0xff] }
  0x31   :  { %515 = vmatmul.f32.gmra.mxu3 %v153_v52  ;;  %900 = vmatpush.msrb.mxu1 %v328_v53  ;;  %v271_v51 = vld [vmem:[%s1883_s2 + $0x118] sm:$0xff]  ;;  %v320_v52 = vld [vmem:[%s1883_s2 + $0x2a0] sm:$0xff] }
  0x32   :  { %561 = vmatpush.msrb.mxu2 %v280_v54  ;;  %674 = vmatpush.msrb.mxu3 %v296_v55  ;;  %v287_v53 = vld [vmem:[%s1883_s2 + $0x198] sm:$0xff]  ;;  %v98_v55 = vld [vmem:[#allocation3 + $0x1b0] sm:$0xff] }
  0x33   :  { %788 = vmatpush.msrb.mxu0 %v311_v56  ;;  %901 = vmatpush.msrb.mxu1 %v327_v57  ;;  %v303_v54 = vld [vmem:[%s1883_s2 + $0x218] sm:$0xff]  ;;  %v200_v56 = vld [vmem:[#allocation3 + $0x4e0] sm:$0xff] }
  0x34   :  { %562 = vmatpush.msrb.mxu2 %v279_v58  ;;  %675 = vmatpush.msrb.mxu3 %v295_v59  ;;  %v99_v57 = vld [vmem:[#allocation3 + $0x1b8] sm:$0xff]  ;;  %v201_v58 = vld [vmem:[#allocation3 + $0x4e8] sm:$0xff]  ;;  %v270_v59 = vld [vmem:[%s1883_s2 + $0x110] sm:$0xff] }
  0x35   :  { %789 = vmatpush.msrb.mxu0 %v310_v60  ;;  %902 = vmatpush.msrb.mxu1 %v326_v61  ;;  %v319_v60 = vld [vmem:[%s1883_s2 + $0x298] sm:$0xff]  ;;  %v286_v61 = vld [vmem:[%s1883_s2 + $0x190] sm:$0xff] }
  0x36   :  { %354 = vmatmul.f32.gmra.mxu0 %v56_v62  ;;  %563 = vmatpush.msrb.mxu2 %v278_v63  ;;  %v269_v62 = vld [vmem:[%s1883_s2 + $0x108] sm:$0xff]  ;;  %v302_v63 = vld [vmem:[%s1883_s2 + $0x210] sm:$0xff] }
  0x37   :  { %405 = vmatmul.f32.gmra.mxu2 %v158_v0  ;;  %467 = vmatmul.f32.gmra.mxu1 %v57_v1  ;;  %v104_v0 = vld [vmem:[#allocation3 + $0x1e0] sm:$0xff]  ;;  %v206_v1 = vld [vmem:[#allocation3 + $0x510] sm:$0xff] }
  0x38   :  { %676 = vmatpush.msrb.mxu3 %v294_v2  ;;  %564 = vmatpush.msrb.mxu2 %v277_v4  ;;  %v105_v2 = vld [vmem:[#allocation3 + $0x1e8] sm:$0xff] }
  0x39   :  { %518 = vmatmul.f32.gmra.mxu3 %v159_v3  ;;  %790 = vmatpush.msrb.mxu0 %v309_v5  ;;  %v207_v3 = vld [vmem:[#allocation3 + $0x518] sm:$0xff]  ;;  %v285_v4 = vld [vmem:[%s1883_s2 + $0x188] sm:$0xff]  ;;  %v318_v5 = vld [vmem:[%s1883_s2 + $0x290] sm:$0xff] }
  0x3a   :  { %677 = vmatpush.msrb.mxu3 %v293_v6  ;;  %903 = vmatpush.msrb.mxu1 %v325_v7  ;;  %v268_v6 = vld [vmem:[%s1883_s2 + $0x100] sm:$0xff]  ;;  %v301_v7 = vld [vmem:[%s1883_s2 + $0x208] sm:$0xff] }
  0x3b   :  { %565 = vmatpush.msrb.mxu2 %v276_v12  ;;  %791 = vmatpush.msrb.mxu0 %v308_v13  ;;  %v284_v12 = vld [vmem:[%s1883_s2 + $0x180] sm:$0xff]  ;;  %v317_v13 = vld [vmem:[%s1883_s2 + $0x288] sm:$0xff] }
  0x3c   :  { %678 = vmatpush.msrb.mxu3 %v292_v14  ;;  %904 = vmatpush.msrb.mxu1 %v324_v15  ;;  %v116_v14 = vld [vmem:[#allocation3 + $0x240] sm:$0xff]  ;;  %v218_v15 = vld [vmem:[#allocation3 + $0x570] sm:$0xff] }
  0x3d   :  { %566 = vmatpush.msrb.mxu2 %v275_v20  ;;  %792 = vmatpush.msrb.mxu0 %v307_v22  ;;  %v122_v20 = vld [vmem:[#allocation3 + $0x270] sm:$0xff]  ;;  %v123_v22 = vld [vmem:[#allocation3 + $0x278] sm:$0xff] }
  0x3e   :  { %357 = vmatmul.f32.gmra.mxu0 %v62_v8  ;;  %679 = vmatpush.msrb.mxu3 %v291_v21  ;;  %v110_v8 = vld [vmem:[#allocation3 + $0x210] sm:$0xff]  ;;  %v224_v21 = vld [vmem:[#allocation3 + $0x5a0] sm:$0xff] }
  0x3f   :  { %408 = vmatmul.f32.gmra.mxu2 %v164_v9  ;;  %470 = vmatmul.f32.gmra.mxu1 %v63_v10  ;;  %v212_v9 = vld [vmem:[#allocation3 + $0x540] sm:$0xff]  ;;  %v111_v10 = vld [vmem:[#allocation3 + $0x218] sm:$0xff] }
  0x40   :  { %905 = vmatpush.msrb.mxu1 %v323_v23  ;;  %567 = vmatpush.msrb.mxu2 %v274_v28  ;;  %v225_v23 = vld [vmem:[#allocation3 + $0x5a8] sm:$0xff]  ;;  %v134_v28 = vld [vmem:[#allocation3 + $0x2d0] sm:$0xff] }
  0x41   :  { %521 = vmatmul.f32.gmra.mxu3 %v165_v11  ;;  %793 = vmatpush.msrb.mxu0 %v306_v30  ;;  %v213_v11 = vld [vmem:[#allocation3 + $0x548] sm:$0xff]  ;;  %v46_v30 = vld [vmem:[#allocation3 + $0x10] sm:$0xff] }
  0x42   :  { %680 = vmatpush.msrb.mxu3 %v290_v29  ;;  %906 = vmatpush.msrb.mxu1 %v322_v31  ;;  %v135_v29 = vld [vmem:[#allocation3 + $0x2d8] sm:$0xff] }
  0x43   :  { %568 = vmatpush.msrb.mxu2 %v273_v36  ;;  %794 = vmatpush.msrb.mxu0 %v305_v38  ;;  %v47_v31 = vld [vmem:[#allocation3 + $0x18] sm:$0xff]  ;;  %v52_v36 = vld [vmem:[#allocation3 + $0x40] sm:$0xff] }
  0x44   :  { %681 = vmatpush.msrb.mxu3 %v289_v37  ;;  %907 = vmatpush.msrb.mxu1 %v321_v39  ;;  %v53_v37 = vld [vmem:[#allocation3 + $0x48] sm:$0xff] }
  0x45   :  { %569 = vmatpush.msrb.mxu2 %v272_v44  ;;  %795 = vmatpush.msrb.mxu0 %v304_v46  ;;  %v49_v44 = vld [vmem:[#allocation3 + $0x28] sm:$0xff]  ;;  %v59_v46 = vld [vmem:[#allocation3 + $0x78] sm:$0xff] }
  0x46   :  { %360 = vmatmul.f32.gmra.mxu0 %v68_v16  ;;  %682 = vmatpush.msrb.mxu3 %v288_v45  ;;  %v117_v16 = vld [vmem:[#allocation3 + $0x248] sm:$0xff] }
  0x47   :  { %411 = vmatmul.f32.gmra.mxu2 %v170_v17  ;;  %473 = vmatmul.f32.gmra.mxu1 %v69_v18  ;;  %v219_v17 = vld [vmem:[#allocation3 + $0x578] sm:$0xff]  ;;  %v300_v18 = vld [vmem:[%s1883_s2 + $0x200] sm:$0xff] }
  0x48   :  { %570 = vmatpush.msrb.mxu2 %v271_v51  ;;  %908 = vmatpush.msrb.mxu1 %v320_v52  ;;  %v64_v52 = vld [vmem:[#allocation3 + $0xa0] sm:$0xff] }
  0x49   :  { %524 = vmatmul.f32.gmra.mxu3 %v171_v19  ;;  %796 = vmatpush.msrb.mxu0 %v303_v54  ;;  %v316_v19 = vld [vmem:[%s1883_s2 + $0x280] sm:$0xff] }
  0x4a   :  { %683 = vmatpush.msrb.mxu3 %v287_v53  ;;  %571 = vmatpush.msrb.mxu2 %v270_v59  ;;  %v55_v53 = vld [vmem:[#allocation3 + $0x58] sm:$0xff] }
  0x4b   :  { %909 = vmatpush.msrb.mxu1 %v319_v60  ;;  %797 = vmatpush.msrb.mxu0 %v302_v63 }
  0x4c   :  { %684 = vmatpush.msrb.mxu3 %v286_v61  ;;  %572 = vmatpush.msrb.mxu2 %v269_v62  ;;  %v70_v61 = vld [vmem:[#allocation3 + $0xd0] sm:$0xff]  ;;  %v61_v62 = vld [vmem:[#allocation3 + $0x88] sm:$0xff] }
  0x4d   :  { %910 = vmatpush.msrb.mxu1 %v318_v5  ;;  %798 = vmatpush.msrb.mxu0 %v301_v7  ;;  %v67_v7 = vld [vmem:[#allocation3 + $0xb8] sm:$0xff] }
  0x4e   :  { %363 = vmatmul.f32.gmra.mxu0 %v74_v24  ;;  %685 = vmatpush.msrb.mxu3 %v285_v4  ;;  %v128_v24 = vld [vmem:[#allocation3 + $0x2a0] sm:$0xff] }
  0x4f   :  { %414 = vmatmul.f32.gmra.mxu2 %v176_v25  ;;  %476 = vmatmul.f32.gmra.mxu1 %v75_v26  ;;  %v230_v25 = vld [vmem:[#allocation3 + $0x5d0] sm:$0xff]  ;;  %v129_v26 = vld [vmem:[#allocation3 + $0x2a8] sm:$0xff] }
  0x50   :  { %573 = vmatpush.msrb.mxu2 %v268_v6  ;;  %686 = vmatpush.msrb.mxu3 %v284_v12  ;;  %v76_v6 = vld [vmem:[#allocation3 + $0x100] sm:$0xff] }
  0x51   :  { %527 = vmatmul.f32.gmra.mxu3 %v177_v27  ;;  %911 = vmatpush.msrb.mxu1 %v317_v13  ;;  %v231_v27 = vld [vmem:[#allocation3 + $0x5d8] sm:$0xff]  ;;  %v72_v12 = vld [vmem:[#allocation3 + $0xe0] sm:$0xff] }
  0x52   :  { %799 = vmatpush.msrb.mxu0 %v300_v18  ;;  %v83_v18 = vld [vmem:[#allocation3 + $0x138] sm:$0xff] }
  0x53   :  { %912 = vmatpush.msrb.mxu1 %v316_v19 }
  0x56   :  { %366 = vmatmul.f32.gmra.mxu0 %v80_v32 }
  0x57   :  { %417 = vmatmul.f32.gmra.mxu2 %v182_v33  ;;  %479 = vmatmul.f32.gmra.mxu1 %v81_v34  ;;  %v140_v33 = vld [vmem:[#allocation3 + $0x300] sm:$0xff] }
  0x59   :  { %530 = vmatmul.f32.gmra.mxu3 %v183_v35  ;;  %v141_v35 = vld [vmem:[#allocation3 + $0x308] sm:$0xff] }
  0x5e   :  { %369 = vmatmul.f32.gmra.mxu0 %v86_v40  ;;  %v48_v40 = vld [vmem:[#allocation3 + $0x20] sm:$0xff] }
  0x5f   :  { %420 = vmatmul.f32.gmra.mxu2 %v188_v41  ;;  %482 = vmatmul.f32.gmra.mxu1 %v87_v42 }
  0x61   :  { %533 = vmatmul.f32.gmra.mxu3 %v189_v43  ;;  %v58_v43 = vld [vmem:[#allocation3 + $0x70] sm:$0xff] }
  0x66   :  { %372 = vmatmul.f32.gmra.mxu0 %v92_v47 }
  0x67   :  { %423 = vmatmul.f32.gmra.mxu2 %v194_v48  ;;  %485 = vmatmul.f32.gmra.mxu1 %v93_v49  ;;  %v54_v49 = vld [vmem:[#allocation3 + $0x50] sm:$0xff] }
  0x69   :  { %536 = vmatmul.f32.gmra.mxu3 %v195_v50 }
  0x6e   :  { %375 = vmatmul.f32.gmra.mxu0 %v98_v55  ;;  %v65_v55 = vld [vmem:[#allocation3 + $0xa8] sm:$0xff] }
  0x6f   :  { %426 = vmatmul.f32.gmra.mxu2 %v200_v56  ;;  %488 = vmatmul.f32.gmra.mxu1 %v99_v57 }
  0x71   :  { %539 = vmatmul.f32.gmra.mxu3 %v201_v58  ;;  %v60_v58 = vld [vmem:[#allocation3 + $0x80] sm:$0xff] }
  0x76   :  { %378 = vmatmul.f32.gmra.mxu0 %v104_v0  ;;  %v71_v0 = vld [vmem:[#allocation3 + $0xd8] sm:$0xff] }
  0x77   :  { %429 = vmatmul.f32.gmra.mxu2 %v206_v1  ;;  %491 = vmatmul.f32.gmra.mxu1 %v105_v2 }
  0x79   :  { %542 = vmatmul.f32.gmra.mxu3 %v207_v3  ;;  %v66_v3 = vld [vmem:[#allocation3 + $0xb0] sm:$0xff] }
  0x7e   :  { %381 = vmatmul.f32.gmra.mxu0 %v110_v8 }
  0x7f   :  { %432 = vmatmul.f32.gmra.mxu2 %v212_v9  ;;  %494 = vmatmul.f32.gmra.mxu1 %v111_v10  ;;  %v77_v9 = vld [vmem:[#allocation3 + $0x108] sm:$0xff] }
  0x81   :  { %545 = vmatmul.f32.gmra.mxu3 %v213_v11 }
  0x86   :  { %384 = vmatmul.f32.gmra.mxu0 %v116_v14 }
  0x87   :  { %435 = vmatmul.f32.gmra.mxu2 %v218_v15  ;;  %497 = vmatmul.f32.gmra.mxu1 %v117_v16  ;;  %v82_v15 = vld [vmem:[#allocation3 + $0x130] sm:$0xff]  ;;  %v73_v16 = vld [vmem:[#allocation3 + $0xe8] sm:$0xff] }
  0x89   :  { %548 = vmatmul.f32.gmra.mxu3 %v219_v17 }
  0x8e   :  { %387 = vmatmul.f32.gmra.mxu0 %v122_v20 }
  0x8f   :  { %438 = vmatmul.f32.gmra.mxu2 %v224_v21  ;;  %500 = vmatmul.f32.gmra.mxu1 %v123_v22  ;;  %v78_v21 = vld [vmem:[#allocation3 + $0x110] sm:$0xff] }
  0x91   :  { %551 = vmatmul.f32.gmra.mxu3 %v225_v23 }
  0x96   :  { %390 = vmatmul.f32.gmra.mxu0 %v128_v24  ;;  %v88_v24 = vld [vmem:[#allocation3 + $0x160] sm:$0xff] }
  0x97   :  { %441 = vmatmul.f32.gmra.mxu2 %v230_v25  ;;  %503 = vmatmul.f32.gmra.mxu1 %v129_v26  ;;  %v79_v25 = vld [vmem:[#allocation3 + $0x118] sm:$0xff] }
  0x99   :  { %554 = vmatmul.f32.gmra.mxu3 %v231_v27  ;;  %v89_v27 = vld [vmem:[#allocation3 + $0x168] sm:$0xff] }
  0x9e   :  { %393 = vmatmul.f32.gmra.mxu0 %v134_v28 }
  0x9f   :  { %506 = vmatmul.f32.gmra.mxu1 %v135_v29  ;;  %574 = vmatmul.f32.vlgmr.msrb.gmra.mxu2 %v46_v30  ;;  %v84_v30 = vld [vmem:[#allocation3 + $0x140] sm:$0xff] }
  0xa1   :  { %687 = vmatmul.f32.vlgmr.msrb.gmra.mxu3 %v47_v31 }
  0xa3   :  { %v1653_v32 = vpop.f32.mrf.mxu0 }
  0xa4   :  { %v1655_v34 = vpop.f32.mrf.mxu1 }
  0xa6   :  { %396 = vmatmul.f32.gmra.mxu0 %v140_v33 }
  0xa7   :  { %509 = vmatmul.f32.gmra.mxu1 %v141_v35  ;;  %577 = vmatmul.f32.gmra.mxu2 %v52_v36  ;;  %v94_v35 = vld [vmem:[#allocation3 + $0x190] sm:$0xff]  ;;  %v85_v36 = vld [vmem:[#allocation3 + $0x148] sm:$0xff] }
  0xa9   :  { %690 = vmatmul.f32.gmra.mxu3 %v53_v37 }
  0xaa   :  { %v400_v38 = vpop.f32.mrf.mxu2 }
  0xab   :  { %v1657_v39 = vpop.f32.mrf.mxu0 }
  0xac   :  { %v1659_v41 = vpop.f32.mrf.mxu1  ;;  %v513_v42 = vpop.f32.mrf.mxu3 }
  0xad   :  { %v1661_v45 = vadd.f32 %v513_v42, %v400_v38  ;;  %v95_v38 = vld [vmem:[#allocation3 + $0x198] sm:$0xff] }
  0xae   :  { %800 = vmatmul.f32.vlgmr.msrb.gmra.mxu0 %v48_v40 }
  0xaf   :  { %580 = vmatmul.f32.gmra.mxu2 %v58_v43  ;;  %913 = vmatmul.f32.vlgmr.msrb.gmra.mxu1 %v49_v44  ;;  %v90_v43 = vld [vmem:[#allocation3 + $0x170] sm:$0xff] }
  0xb1   :  { %693 = vmatmul.f32.gmra.mxu3 %v59_v46 }
  0xb2   :  { %v403_v47 = vpop.f32.mrf.mxu2 }
  0xb3   :  { %v1663_v48 = vpop.f32.mrf.mxu0 }
  0xb4   :  { %v1665_v50 = vpop.f32.mrf.mxu1  ;;  %v516_v51 = vpop.f32.mrf.mxu3 }
  0xb5   :  { %v1667_v54 = vadd.f32 %v516_v51, %v403_v47  ;;  %v100_v47 = vld [vmem:[#allocation3 + $0x1c0] sm:$0xff] }
  0xb6   :  { %803 = vmatmul.f32.gmra.mxu0 %v54_v49  ;;  %v91_v49 = vld [vmem:[#allocation3 + $0x178] sm:$0xff] }
  0xb7   :  { %583 = vmatmul.f32.gmra.mxu2 %v64_v52  ;;  %916 = vmatmul.f32.gmra.mxu1 %v55_v53  ;;  %v101_v52 = vld [vmem:[#allocation3 + $0x1c8] sm:$0xff] }
  0xb9   :  { %696 = vmatmul.f32.gmra.mxu3 %v65_v55 }
  0xba   :  { %v406_v56 = vpop.f32.mrf.mxu2 }
  0xbb   :  { %v1669_v57 = vpop.f32.mrf.mxu0 }
  0xbc   :  { %v1671_v59 = vpop.f32.mrf.mxu1  ;;  %v519_v60 = vpop.f32.mrf.mxu3 }
  0xbd   :  { %v1673_v63 = vadd.f32 %v519_v60, %v406_v56  ;;  %v96_v56 = vld [vmem:[#allocation3 + $0x1a0] sm:$0xff] }
  0xbe   :  { %806 = vmatmul.f32.gmra.mxu0 %v60_v58 }
  0xbf   :  { %586 = vmatmul.f32.gmra.mxu2 %v70_v61  ;;  %919 = vmatmul.f32.gmra.mxu1 %v61_v62  ;;  %v106_v61 = vld [vmem:[#allocation3 + $0x1f0] sm:$0xff]  ;;  %v97_v62 = vld [vmem:[#allocation3 + $0x1a8] sm:$0xff] }
  0xc1   :  { %699 = vmatmul.f32.gmra.mxu3 %v71_v0 }
  0xc2   :  { %v409_v1 = vpop.f32.mrf.mxu2 }
  0xc3   :  { %v1675_v2 = vpop.f32.mrf.mxu0 }
  0xc4   :  { %v1677_v4 = vpop.f32.mrf.mxu1  ;;  %v522_v5 = vpop.f32.mrf.mxu3 }
  0xc5   :  { %v1679_v8 = vadd.f32 %v522_v5, %v409_v1  ;;  %v107_v1 = vld [vmem:[#allocation3 + $0x1f8] sm:$0xff] }
  0xc6   :  { %809 = vmatmul.f32.gmra.mxu0 %v66_v3 }
  0xc7   :  { %589 = vmatmul.f32.gmra.mxu2 %v76_v6  ;;  %922 = vmatmul.f32.gmra.mxu1 %v67_v7  ;;  %v102_v6 = vld [vmem:[#allocation3 + $0x1d0] sm:$0xff] }
  0xc9   :  { %702 = vmatmul.f32.gmra.mxu3 %v77_v9 }
  0xca   :  { %v412_v10 = vpop.f32.mrf.mxu2 }
  0xcb   :  { %v1681_v11 = vpop.f32.mrf.mxu0 }
  0xcc   :  { %v1683_v13 = vpop.f32.mrf.mxu1  ;;  %v525_v14 = vpop.f32.mrf.mxu3 }
  0xcd   :  { %v1685_v17 = vadd.f32 %v525_v14, %v412_v10  ;;  %v112_v10 = vld [vmem:[#allocation3 + $0x220] sm:$0xff] }
  0xce   :  { %812 = vmatmul.f32.gmra.mxu0 %v72_v12  ;;  %v103_v12 = vld [vmem:[#allocation3 + $0x1d8] sm:$0xff] }
  0xcf   :  { %592 = vmatmul.f32.gmra.mxu2 %v82_v15  ;;  %925 = vmatmul.f32.gmra.mxu1 %v73_v16  ;;  %v113_v15 = vld [vmem:[#allocation3 + $0x228] sm:$0xff] }
  0xd1   :  { %705 = vmatmul.f32.gmra.mxu3 %v83_v18 }
  0xd2   :  { %v415_v19 = vpop.f32.mrf.mxu2 }
  0xd3   :  { %v1687_v20 = vpop.f32.mrf.mxu0 }
  0xd4   :  { %v1689_v22 = vpop.f32.mrf.mxu1  ;;  %v528_v23 = vpop.f32.mrf.mxu3 }
  0xd5   :  { %v1691_v26 = vadd.f32 %v528_v23, %v415_v19  ;;  %v108_v19 = vld [vmem:[#allocation3 + $0x200] sm:$0xff] }
  0xd6   :  { %815 = vmatmul.f32.gmra.mxu0 %v78_v21 }
  0xd7   :  { %595 = vmatmul.f32.gmra.mxu2 %v88_v24  ;;  %928 = vmatmul.f32.gmra.mxu1 %v79_v25  ;;  %v118_v24 = vld [vmem:[#allocation3 + $0x250] sm:$0xff]  ;;  %v109_v25 = vld [vmem:[#allocation3 + $0x208] sm:$0xff] }
  0xd9   :  { %708 = vmatmul.f32.gmra.mxu3 %v89_v27 }
  0xda   :  { %v418_v28 = vpop.f32.mrf.mxu2 }
  0xdb   :  { %v1693_v29 = vpop.f32.mrf.mxu0 }
  0xdc   :  { %v1695_v31 = vpop.f32.mrf.mxu1  ;;  %v531_v33 = vpop.f32.mrf.mxu3 }
  0xdd   :  { %v1697_v37 = vadd.f32 %v531_v33, %v418_v28  ;;  %v119_v28 = vld [vmem:[#allocation3 + $0x258] sm:$0xff] }
  0xde   :  { %818 = vmatmul.f32.gmra.mxu0 %v84_v30 }
  0xdf   :  { %598 = vmatmul.f32.gmra.mxu2 %v94_v35  ;;  %931 = vmatmul.f32.gmra.mxu1 %v85_v36  ;;  %v114_v35 = vld [vmem:[#allocation3 + $0x230] sm:$0xff] }
  0xe1   :  { %711 = vmatmul.f32.gmra.mxu3 %v95_v38 }
  0xe2   :  { %v421_v40 = vpop.f32.mrf.mxu2 }
  0xe3   :  { %v1699_v42 = vpop.f32.mrf.mxu0 }
  0xe4   :  { %v1701_v44 = vpop.f32.mrf.mxu1  ;;  %v534_v46 = vpop.f32.mrf.mxu3 }
  0xe5   :  { %v1703_v51 = vadd.f32 %v534_v46, %v421_v40  ;;  %v124_v40 = vld [vmem:[#allocation3 + $0x280] sm:$0xff] }
  0xe6   :  { %821 = vmatmul.f32.gmra.mxu0 %v90_v43  ;;  %v115_v43 = vld [vmem:[#allocation3 + $0x238] sm:$0xff] }
  0xe7   :  { %601 = vmatmul.f32.gmra.mxu2 %v100_v47  ;;  %934 = vmatmul.f32.gmra.mxu1 %v91_v49  ;;  %v125_v47 = vld [vmem:[#allocation3 + $0x288] sm:$0xff] }
  0xe9   :  { %714 = vmatmul.f32.gmra.mxu3 %v101_v52 }
  0xea   :  { %v424_v53 = vpop.f32.mrf.mxu2 }
  0xeb   :  { %v1705_v55 = vpop.f32.mrf.mxu0 }
  0xec   :  { %v1707_v58 = vpop.f32.mrf.mxu1  ;;  %v537_v60 = vpop.f32.mrf.mxu3 }
  0xed   :  { %v1709_v0 = vadd.f32 %v537_v60, %v424_v53  ;;  %v120_v53 = vld [vmem:[#allocation3 + $0x260] sm:$0xff] }
  0xee   :  { %824 = vmatmul.f32.gmra.mxu0 %v96_v56 }
  0xef   :  { %604 = vmatmul.f32.gmra.mxu2 %v106_v61  ;;  %937 = vmatmul.f32.gmra.mxu1 %v97_v62  ;;  %v130_v61 = vld [vmem:[#allocation3 + $0x2b0] sm:$0xff]  ;;  %v121_v62 = vld [vmem:[#allocation3 + $0x268] sm:$0xff] }
  0xf1   :  { %717 = vmatmul.f32.gmra.mxu3 %v107_v1 }
  0xf2   :  { %v427_v3 = vpop.f32.mrf.mxu2 }
  0xf3   :  { %v1711_v5 = vpop.f32.mrf.mxu0 }
  0xf4   :  { %v1713_v7 = vpop.f32.mrf.mxu1  ;;  %v540_v9 = vpop.f32.mrf.mxu3 }
  0xf5   :  { %v1715_v14 = vadd.f32 %v540_v9, %v427_v3  ;;  %v131_v3 = vld [vmem:[#allocation3 + $0x2b8] sm:$0xff] }
  0xf6   :  { %827 = vmatmul.f32.gmra.mxu0 %v102_v6 }
  0xf7   :  { %607 = vmatmul.f32.gmra.mxu2 %v112_v10  ;;  %940 = vmatmul.f32.gmra.mxu1 %v103_v12  ;;  %v126_v10 = vld [vmem:[#allocation3 + $0x290] sm:$0xff] }
  0xf9   :  { %720 = vmatmul.f32.gmra.mxu3 %v113_v15 }
  0xfa   :  { %v430_v16 = vpop.f32.mrf.mxu2 }
  0xfb   :  { %v1717_v18 = vpop.f32.mrf.mxu0 }
  0xfc   :  { %v1719_v21 = vpop.f32.mrf.mxu1  ;;  %v543_v23 = vpop.f32.mrf.mxu3 }
  0xfd   :  { %v1721_v27 = vadd.f32 %v543_v23, %v430_v16  ;;  %v136_v16 = vld [vmem:[#allocation3 + $0x2e0] sm:$0xff] }
  0xfe   :  { %830 = vmatmul.f32.gmra.mxu0 %v108_v19  ;;  %v127_v19 = vld [vmem:[#allocation3 + $0x298] sm:$0xff] }
  0xff   :  { %610 = vmatmul.f32.gmra.mxu2 %v118_v24  ;;  %943 = vmatmul.f32.gmra.mxu1 %v109_v25  ;;  %v137_v24 = vld [vmem:[#allocation3 + $0x2e8] sm:$0xff] }
 0x101   :  { %723 = vmatmul.f32.gmra.mxu3 %v119_v28 }
 0x102   :  { %v433_v30 = vpop.f32.mrf.mxu2 }
 0x103   :  { %v1723_v33 = vpop.f32.mrf.mxu0 }
 0x104   :  { %v1725_v36 = vpop.f32.mrf.mxu1  ;;  %v546_v38 = vpop.f32.mrf.mxu3 }
 0x105   :  { %v1727_v46 = vadd.f32 %v546_v38, %v433_v30  ;;  %v132_v30 = vld [vmem:[#allocation3 + $0x2c0] sm:$0xff] }
 0x106   :  { %833 = vmatmul.f32.gmra.mxu0 %v114_v35 }
 0x107   :  { %613 = vmatmul.f32.gmra.mxu2 %v124_v40  ;;  %946 = vmatmul.f32.gmra.mxu1 %v115_v43  ;;  %v142_v40 = vld [vmem:[#allocation3 + $0x310] sm:$0xff]  ;;  %v133_v43 = vld [vmem:[#allocation3 + $0x2c8] sm:$0xff] }
 0x109   :  { %726 = vmatmul.f32.gmra.mxu3 %v125_v47 }
 0x10a   :  { %v436_v49 = vpop.f32.mrf.mxu2 }
 0x10b   :  { %v1729_v52 = vpop.f32.mrf.mxu0 }
 0x10c   :  { %v1731_v56 = vpop.f32.mrf.mxu1  ;;  %v549_v60 = vpop.f32.mrf.mxu3 }
 0x10d   :  { %v1733_v1 = vadd.f32 %v549_v60, %v436_v49  ;;  %v143_v49 = vld [vmem:[#allocation3 + $0x318] sm:$0xff] }
 0x10e   :  { %836 = vmatmul.f32.gmra.mxu0 %v120_v53 }
 0x10f   :  { %616 = vmatmul.f32.gmra.mxu2 %v130_v61  ;;  %949 = vmatmul.f32.gmra.mxu1 %v121_v62  ;;  %v138_v61 = vld [vmem:[#allocation3 + $0x2f0] sm:$0xff]  ;;  %v463_v62 = vadd.f32 %v1655_v34, %v1653_v32 }
 0x111   :  { %729 = vmatmul.f32.gmra.mxu3 %v131_v3 }
 0x112   :  { %v439_v6 = vpop.f32.mrf.mxu2 }
 0x113   :  { %v1735_v9 = vpop.f32.mrf.mxu0 }
 0x114   :  { %v1737_v12 = vpop.f32.mrf.mxu1  ;;  %v552_v15 = vpop.f32.mrf.mxu3 }
 0x115   :  { %v1739_v23 = vadd.f32 %v552_v15, %v439_v6  ;;  %v139_v15 = vld [vmem:[#allocation3 + $0x2f8] sm:$0xff] }
 0x116   :  { %839 = vmatmul.f32.gmra.mxu0 %v126_v10  ;;  %v148_v10 = vld [vmem:[#allocation3 + $0x340] sm:$0xff] }
 0x117   :  { %1889 = vst [vmem:[#allocation9_spill] sm:$0xff] %v1739_v23  ;;  %619 = vmatmul.f32.gmra.mxu2 %v136_v16  ;;  %952 = vmatmul.f32.gmra.mxu1 %v127_v19  ;;  %v149_v19 = vld [vmem:[#allocation3 + $0x348] sm:$0xff] }
 0x119   :  { %732 = vmatmul.f32.gmra.mxu3 %v137_v24 }
 0x11a   :  { %v442_v25 = vpop.f32.mrf.mxu2 }
 0x11b   :  { %v1741_v28 = vpop.f32.mrf.mxu0 }
 0x11c   :  { %v1743_v35 = vpop.f32.mrf.mxu1  ;;  %v555_v38 = vpop.f32.mrf.mxu3 }
 0x11d   :  { %v1745_v47 = vadd.f32 %v555_v38, %v442_v25  ;;  %v144_v38 = vld [vmem:[#allocation3 + $0x320] sm:$0xff] }
 0x11e   :  { %842 = vmatmul.f32.gmra.mxu0 %v132_v30 }
 0x11f   :  { %1890 = vst [vmem:[#allocation10_spill] sm:$0xff] %v1745_v47  ;;  %622 = vmatmul.f32.gmra.mxu2 %v142_v40  ;;  %955 = vmatmul.f32.gmra.mxu1 %v133_v43  ;;  %v466_v40 = vadd.f32 %v1659_v41, %v1657_v39  ;;  %v145_v47 = vld [vmem:[#allocation3 + $0x328] sm:$0xff]  ;;  %v469_v39 = vadd.f32 %v1665_v50, %v1663_v48 }
 0x120   :  { %v472_v48 = vadd.f32 %v1671_v59, %v1669_v57  ;;  %v475_v57 = vadd.f32 %v1677_v4, %v1675_v2  ;;  %v478_v2 = vadd.f32 %v1683_v13, %v1681_v11  ;;  %v481_v11 = vadd.f32 %v1689_v22, %v1687_v20 }
 0x121   :  { %735 = vmatmul.f32.gmra.mxu3 %v143_v49  ;;  %v154_v49 = vld [vmem:[#allocation3 + $0x370] sm:$0xff]  ;;  %v484_v20 = vadd.f32 %v1695_v31, %v1693_v29  ;;  %v487_v29 = vadd.f32 %v1701_v44, %v1699_v42  ;;  %v490_v42 = vadd.f32 %v1707_v58, %v1705_v55  ;;  %v493_v55 = vadd.f32 %v1713_v7, %v1711_v5 }
 0x122   :  { %v575_v53 = vpop.f32.mrf.mxu2  ;;  %v496_v5 = vadd.f32 %v1719_v21, %v1717_v18  ;;  %v499_v18 = vadd.f32 %v1725_v36, %v1723_v33  ;;  %v502_v33 = vadd.f32 %v1731_v56, %v1729_v52  ;;  %v505_v52 = vadd.f32 %v1737_v12, %v1735_v9 }
 0x123   :  { %v1747_v60 = vpop.f32.mrf.mxu0  ;;  %v576_v16 = vadd.f32 %v575_v53, %v463_v62  ;;  %v155_v53 = vld [vmem:[#allocation3 + $0x378] sm:$0xff]  ;;  %v508_v9 = vadd.f32 %v1743_v35, %v1741_v28 }
 0x124   :  { %v1751_v3 = vpop.f32.mrf.mxu1  ;;  %v688_v6 = vpop.f32.mrf.mxu3 }
 0x125   :  { %v689_v24 = vadd.f32 %v688_v6, %v576_v16  ;;  %v511_v28 = vadd.f32 %v1751_v3, %v1747_v60  ;;  %v1122_v60 = vld [vmem:[%s1884_s3 + $0x70] sm:$0xff] }
 0x126   :  { %845 = vmatmul.f32.gmra.mxu0 %v138_v61 }
 0x127   :  { %625 = vmatmul.f32.gmra.mxu2 %v148_v10  ;;  %958 = vmatmul.f32.gmra.mxu1 %v139_v15  ;;  %v150_v15 = vld [vmem:[#allocation3 + $0x350] sm:$0xff] }
 0x129   :  { %738 = vmatmul.f32.gmra.mxu3 %v149_v19 }
 0x12a   :  { %v578_v25 = vpop.f32.mrf.mxu2 }
 0x12b   :  { %v801_v30 = vpop.f32.mrf.mxu0  ;;  %v579_v23 = vadd.f32 %v578_v25, %v466_v40 }
 0x12c   :  { %v691_v43 = vpop.f32.mrf.mxu3  ;;  %v802_v32 = vadd.f32 %v801_v30, %v689_v24  ;;  %v914_v34 = vpop.f32.mrf.mxu1  ;;  %v160_v24 = vld [vmem:[#allocation3 + $0x3a0] sm:$0xff]  ;;  %v151_v30 = vld [vmem:[#allocation3 + $0x358] sm:$0xff] }
 0x12d   :  { %v692_v62 = vadd.f32 %v691_v43, %v579_v23 }
 0x12e   :  { %848 = vmatmul.f32.gmra.mxu0 %v144_v38  ;;  %v915_v61 = vadd.f32 %v914_v34, %v802_v32  ;;  %v161_v38 = vld [vmem:[#allocation3 + $0x3a8] sm:$0xff]  ;;  %v156_v32 = vld [vmem:[#allocation3 + $0x380] sm:$0xff] }
 0x12f   :  { %628 = vmatmul.f32.gmra.mxu2 %v154_v49  ;;  %961 = vmatmul.f32.gmra.mxu1 %v145_v47 }
 0x130   :  { %1010 = vxpose.xlu0.b32.start [1/16] (narrow) %v915_v61, 8  ;;  %v157_v61 = vld [vmem:[#allocation3 + $0x388] sm:$0xff] }
 0x131   :  { %741 = vmatmul.f32.gmra.mxu3 %v155_v53  ;;  %v166_v53 = vld [vmem:[#allocation3 + $0x3d0] sm:$0xff] }
 0x132   :  { %v581_v6 = vpop.f32.mrf.mxu2 }
 0x133   :  { %v804_v10 = vpop.f32.mrf.mxu0  ;;  %v582_v25 = vadd.f32 %v581_v6, %v469_v39  ;;  %v167_v6 = vld [vmem:[#allocation3 + $0x3d8] sm:$0xff] }
 0x134   :  { %v694_v41 = vpop.f32.mrf.mxu3  ;;  %v805_v16 = vadd.f32 %v804_v10, %v692_v62  ;;  %v917_v19 = vpop.f32.mrf.mxu1 }
 0x135   :  { %v695_v23 = vadd.f32 %v694_v41, %v582_v25  ;;  %v163_v25 = vld [vmem:[#allocation3 + $0x3b8] sm:$0xff] }
 0x136   :  { %851 = vmatmul.f32.gmra.mxu0 %v150_v15  ;;  %v918_v40 = vadd.f32 %v917_v19, %v805_v16  ;;  %v162_v16 = vld [vmem:[#allocation3 + $0x3b0] sm:$0xff] }
 0x137   :  { %631 = vmatmul.f32.gmra.mxu2 %v160_v24  ;;  %964 = vmatmul.f32.gmra.mxu1 %v151_v30  ;;  %v172_v30 = vld [vmem:[#allocation3 + $0x400] sm:$0xff] }
 0x138   :  { %1011 = vxpose.xlu0.b32.cont [2/16] (narrow) %v918_v40, 8  ;;  %v173_v40 = vld [vmem:[#allocation3 + $0x408] sm:$0xff] }
 0x139   :  { %744 = vmatmul.f32.gmra.mxu3 %v161_v38 }
 0x13a   :  { %v584_v47 = vpop.f32.mrf.mxu2 }
 0x13b   :  { %v807_v43 = vpop.f32.mrf.mxu0  ;;  %v585_v62 = vadd.f32 %v584_v47, %v472_v48  ;;  %v168_v48 = vld [vmem:[#allocation3 + $0x3e0] sm:$0xff] }
 0x13c   :  { %v697_v50 = vpop.f32.mrf.mxu3  ;;  %v808_v34 = vadd.f32 %v807_v43, %v695_v23  ;;  %v920_v49 = vpop.f32.mrf.mxu1 }
 0x13d   :  { %v698_v15 = vadd.f32 %v697_v50, %v585_v62  ;;  %v179_v62 = vld [vmem:[#allocation3 + $0x438] sm:$0xff] }
 0x13e   :  { %854 = vmatmul.f32.gmra.mxu0 %v156_v32  ;;  %v921_v10 = vadd.f32 %v920_v49, %v808_v34  ;;  %v178_v49 = vld [vmem:[#allocation3 + $0x430] sm:$0xff] }
 0x13f   :  { %634 = vmatmul.f32.gmra.mxu2 %v166_v53  ;;  %967 = vmatmul.f32.gmra.mxu1 %v157_v61  ;;  %v169_v53 = vld [vmem:[#allocation3 + $0x3e8] sm:$0xff] }
 0x140   :  { %1012 = vxpose.xlu0.b32.cont [3/16] (narrow) %v921_v10, 8 }
 0x141   :  { %747 = vmatmul.f32.gmra.mxu3 %v167_v6 }
 0x142   :  { %v587_v39 = vpop.f32.mrf.mxu2 }
 0x143   :  { %v810_v41 = vpop.f32.mrf.mxu0  ;;  %v588_v38 = vadd.f32 %v587_v39, %v475_v57 }
 0x144   :  { %v700_v59 = vpop.f32.mrf.mxu3  ;;  %v811_v19 = vadd.f32 %v810_v41, %v698_v15  ;;  %v923_v24 = vpop.f32.mrf.mxu1  ;;  %v174_v41 = vld [vmem:[#allocation3 + $0x410] sm:$0xff] }
 0x145   :  { %v701_v47 = vadd.f32 %v700_v59, %v588_v38  ;;  %v184_v59 = vld [vmem:[#allocation3 + $0x460] sm:$0xff] }
 0x146   :  { %857 = vmatmul.f32.gmra.mxu0 %v162_v16  ;;  %v924_v23 = vadd.f32 %v923_v24, %v811_v19  ;;  %v175_v19 = vld [vmem:[#allocation3 + $0x418] sm:$0xff] }
 0x147   :  { %637 = vmatmul.f32.gmra.mxu2 %v172_v30  ;;  %970 = vmatmul.f32.gmra.mxu1 %v163_v25  ;;  %v185_v30 = vld [vmem:[#allocation3 + $0x468] sm:$0xff] }
 0x148   :  { %1013 = vxpose.xlu0.b32.cont [4/16] (narrow) %v924_v23, 8 }
 0x149   :  { %750 = vmatmul.f32.gmra.mxu3 %v173_v40 }
 0x14a   :  { %v590_v43 = vpop.f32.mrf.mxu2 }
 0x14b   :  { %v813_v32 = vpop.f32.mrf.mxu0  ;;  %v591_v61 = vadd.f32 %v590_v43, %v478_v2  ;;  %v181_v2 = vld [vmem:[#allocation3 + $0x448] sm:$0xff] }
 0x14c   :  { %v703_v4 = vpop.f32.mrf.mxu3  ;;  %v814_v50 = vadd.f32 %v813_v32, %v701_v47  ;;  %v926_v34 = vpop.f32.mrf.mxu1  ;;  %v180_v47 = vld [vmem:[#allocation3 + $0x440] sm:$0xff] }
 0x14d   :  { %v704_v10 = vadd.f32 %v703_v4, %v591_v61 }
 0x14e   :  { %860 = vmatmul.f32.gmra.mxu0 %v168_v48  ;;  %v927_v6 = vadd.f32 %v926_v34, %v814_v50  ;;  %v190_v48 = vld [vmem:[#allocation3 + $0x490] sm:$0xff]  ;;  %v191_v50 = vld [vmem:[#allocation3 + $0x498] sm:$0xff] }
 0x14f   :  { %640 = vmatmul.f32.gmra.mxu2 %v178_v49  ;;  %973 = vmatmul.f32.gmra.mxu1 %v169_v53 }
 0x150   :  { %1014 = vxpose.xlu0.b32.cont [5/16] (narrow) %v927_v6, 8 }
 0x151   :  { %753 = vmatmul.f32.gmra.mxu3 %v179_v62  ;;  %v186_v62 = vld [vmem:[#allocation3 + $0x470] sm:$0xff] }
 0x152   :  { %v593_v15 = vpop.f32.mrf.mxu2 }
 0x153   :  { %v816_v39 = vpop.f32.mrf.mxu0  ;;  %v594_v24 = vadd.f32 %v593_v15, %v481_v11  ;;  %v196_v15 = vld [vmem:[#allocation3 + $0x4c0] sm:$0xff]  ;;  %v197_v11 = vld [vmem:[#allocation3 + $0x4c8] sm:$0xff] }
 0x154   :  { %v706_v13 = vpop.f32.mrf.mxu3  ;;  %v817_v16 = vadd.f32 %v816_v39, %v704_v10  ;;  %v929_v57 = vpop.f32.mrf.mxu1  ;;  %v187_v39 = vld [vmem:[#allocation3 + $0x478] sm:$0xff] }
 0x155   :  { %v707_v38 = vadd.f32 %v706_v13, %v594_v24 }
 0x156   :  { %863 = vmatmul.f32.gmra.mxu0 %v174_v41  ;;  %v930_v25 = vadd.f32 %v929_v57, %v817_v16 }
 0x157   :  { %643 = vmatmul.f32.gmra.mxu2 %v184_v59  ;;  %976 = vmatmul.f32.gmra.mxu1 %v175_v19  ;;  %v192_v19 = vld [vmem:[#allocation3 + $0x4a0] sm:$0xff] }
 0x158   :  { %1015 = vxpose.xlu0.b32.cont [6/16] (narrow) %v930_v25, 8  ;;  %v202_v25 = vld [vmem:[#allocation3 + $0x4f0] sm:$0xff] }
 0x159   :  { %756 = vmatmul.f32.gmra.mxu3 %v185_v30 }
 0x15a   :  { %v596_v40 = vpop.f32.mrf.mxu2 }
 0x15b   :  { %v819_v23 = vpop.f32.mrf.mxu0  ;;  %v597_v4 = vadd.f32 %v596_v40, %v484_v20 }
 0x15c   :  { %v709_v22 = vpop.f32.mrf.mxu3  ;;  %v820_v43 = vadd.f32 %v819_v23, %v707_v38  ;;  %v932_v32 = vpop.f32.mrf.mxu1  ;;  %v193_v38 = vld [vmem:[#allocation3 + $0x4a8] sm:$0xff] }
 0x15d   :  { %v710_v49 = vadd.f32 %v709_v22, %v597_v4  ;;  %v208_v4 = vld [vmem:[#allocation3 + $0x520] sm:$0xff] }
 0x15e   :  { %866 = vmatmul.f32.gmra.mxu0 %v180_v47  ;;  %v933_v34 = vadd.f32 %v932_v32, %v820_v43  ;;  %v203_v47 = vld [vmem:[#allocation3 + $0x4f8] sm:$0xff]  ;;  %v198_v32 = vld [vmem:[#allocation3 + $0x4d0] sm:$0xff] }
 0x15f   :  { %646 = vmatmul.f32.gmra.mxu2 %v190_v48  ;;  %979 = vmatmul.f32.gmra.mxu1 %v181_v2 }
 0x160   :  { %1016 = vxpose.xlu0.b32.cont [7/16] (narrow) %v933_v34, 8 }
 0x161   :  { %759 = vmatmul.f32.gmra.mxu3 %v191_v50  ;;  %v199_v50 = vld [vmem:[#allocation3 + $0x4d8] sm:$0xff] }
 0x162   :  { %v599_v53 = vpop.f32.mrf.mxu2 }
 0x163   :  { %v822_v61 = vpop.f32.mrf.mxu0  ;;  %v600_v41 = vadd.f32 %v599_v53, %v487_v29  ;;  %v209_v53 = vld [vmem:[#allocation3 + $0x528] sm:$0xff] }
 0x164   :  { %v712_v31 = vpop.f32.mrf.mxu3  ;;  %v823_v6 = vadd.f32 %v822_v61, %v710_v49  ;;  %v935_v10 = vpop.f32.mrf.mxu1 }
 0x165   :  { %v713_v16 = vadd.f32 %v712_v31, %v600_v41  ;;  %v204_v31 = vld [vmem:[#allocation3 + $0x500] sm:$0xff] }
 0x166   :  { %869 = vmatmul.f32.gmra.mxu0 %v186_v62  ;;  %v936_v13 = vadd.f32 %v935_v10, %v823_v6 }
 0x167   :  { %649 = vmatmul.f32.gmra.mxu2 %v196_v15  ;;  %982 = vmatmul.f32.gmra.mxu1 %v187_v39  ;;  %v214_v15 = vld [vmem:[#allocation3 + $0x550] sm:$0xff]  ;;  %v205_v39 = vld [vmem:[#allocation3 + $0x508] sm:$0xff] }
 0x168   :  { %1017 = vxpose.xlu0.b32.cont [8/16] (narrow) %v936_v13, 8  ;;  %v215_v13 = vld [vmem:[#allocation3 + $0x558] sm:$0xff] }
 0x169   :  { %762 = vmatmul.f32.gmra.mxu3 %v197_v11 }
 0x16a   :  { %v602_v57 = vpop.f32.mrf.mxu2 }
 0x16b   :  { %v825_v59 = vpop.f32.mrf.mxu0  ;;  %v603_v40 = vadd.f32 %v602_v57, %v490_v42 }
 0x16c   :  { %v715_v44 = vpop.f32.mrf.mxu3  ;;  %v826_v24 = vadd.f32 %v825_v59, %v713_v16  ;;  %v938_v30 = vpop.f32.mrf.mxu1 }
 0x16d   :  { %v716_v20 = vadd.f32 %v715_v44, %v603_v40  ;;  %v221_v40 = vld [vmem:[#allocation3 + $0x588] sm:$0xff] }
 0x16e   :  { %v939_v23 = vadd.f32 %v938_v30, %v826_v24  ;;  %872 = vmatmul.f32.gmra.mxu0 %v192_v19  ;;  %v210_v19 = vld [vmem:[#allocation3 + $0x530] sm:$0xff]  ;;  %v220_v24 = vld [vmem:[#allocation3 + $0x580] sm:$0xff]  ;;  %v211_v30 = vld [vmem:[#allocation3 + $0x538] sm:$0xff] }
 0x16f   :  { %652 = vmatmul.f32.gmra.mxu2 %v202_v25  ;;  %985 = vmatmul.f32.gmra.mxu1 %v193_v38 }
 0x170   :  { %1018 = vxpose.xlu0.b32.cont [9/16] (narrow) %v939_v23, 8 }
 0x171   :  { %765 = vmatmul.f32.gmra.mxu3 %v203_v47 }
 0x172   :  { %v605_v22 = vpop.f32.mrf.mxu2 }
 0x173   :  { %v828_v43 = vpop.f32.mrf.mxu0  ;;  %v606_v34 = vadd.f32 %v605_v22, %v493_v55  ;;  %v216_v22 = vld [vmem:[#allocation3 + $0x560] sm:$0xff]  ;;  %v226_v55 = vld [vmem:[#allocation3 + $0x5b0] sm:$0xff] }
 0x174   :  { %v718_v58 = vpop.f32.mrf.mxu3  ;;  %v829_v48 = vadd.f32 %v828_v43, %v716_v20  ;;  %v941_v2 = vpop.f32.mrf.mxu1 }
 0x175   :  { %v719_v61 = vadd.f32 %v718_v58, %v606_v34  ;;  %v217_v58 = vld [vmem:[#allocation3 + $0x568] sm:$0xff] }
 0x176   :  { %v942_v49 = vadd.f32 %v941_v2, %v829_v48  ;;  %875 = vmatmul.f32.gmra.mxu0 %v198_v32 }
 0x177   :  { %655 = vmatmul.f32.gmra.mxu2 %v208_v4  ;;  %988 = vmatmul.f32.gmra.mxu1 %v199_v50  ;;  %v227_v4 = vld [vmem:[#allocation3 + $0x5b8] sm:$0xff] }
 0x178   :  { %1019 = vxpose.xlu0.b32.cont [10/16] (narrow) %v942_v49, 8 }
 0x179   :  { %768 = vmatmul.f32.gmra.mxu3 %v209_v53  ;;  %v222_v53 = vld [vmem:[#allocation3 + $0x590] sm:$0xff] }
 0x17a   :  { %v608_v62 = vpop.f32.mrf.mxu2 }
 0x17b   :  { %v831_v29 = vpop.f32.mrf.mxu0  ;;  %v609_v41 = vadd.f32 %v608_v62, %v496_v5 }
 0x17c   :  { %v721_v7 = vpop.f32.mrf.mxu3  ;;  %v832_v6 = vadd.f32 %v831_v29, %v719_v61  ;;  %v944_v10 = vpop.f32.mrf.mxu1  ;;  %v232_v29 = vld [vmem:[#allocation3 + $0x5e0] sm:$0xff] }
 0x17d   :  { %v722_v16 = vadd.f32 %v721_v7, %v609_v41  ;;  %v228_v41 = vld [vmem:[#allocation3 + $0x5c0] sm:$0xff] }
 0x17e   :  { %v945_v11 = vadd.f32 %v944_v10, %v832_v6  ;;  %878 = vmatmul.f32.gmra.mxu0 %v204_v31  ;;  %v223_v31 = vld [vmem:[#allocation3 + $0x598] sm:$0xff]  ;;  %v233_v6 = vld [vmem:[#allocation3 + $0x5e8] sm:$0xff] }
 0x17f   :  { %658 = vmatmul.f32.gmra.mxu2 %v214_v15  ;;  %991 = vmatmul.f32.gmra.mxu1 %v205_v39 }
 0x180   :  { %1020 = vxpose.xlu0.b32.cont [11/16] (narrow) %v945_v11, 8 }
 0x181   :  { %771 = vmatmul.f32.gmra.mxu3 %v215_v13 }
 0x182   :  { %v611_v57 = vpop.f32.mrf.mxu2 }
 0x183   :  { %v834_v59 = vpop.f32.mrf.mxu0  ;;  %v612_v25 = vadd.f32 %v611_v57, %v499_v18 }
 0x184   :  { %v724_v21 = vpop.f32.mrf.mxu3  ;;  %v835_v42 = vadd.f32 %v834_v59, %v722_v16  ;;  %v947_v44 = vpop.f32.mrf.mxu1  ;;  %v229_v16 = vld [vmem:[#allocation3 + $0x5c8] sm:$0xff] }
 0x185   :  { %v725_v23 = vadd.f32 %v724_v21, %v612_v25  ;;  %v235_v25 = vld [vmem:[#allocation3 + $0x5f8] sm:$0xff] }
 0x186   :  { %v948_v38 = vadd.f32 %v947_v44, %v835_v42  ;;  %881 = vmatmul.f32.gmra.mxu0 %v210_v19  ;;  %v1123_v19 = vld [vmem:[%s1884_s3 + $0x78] sm:$0xff]  ;;  %v234_v44 = vld [vmem:[#allocation3 + $0x5f0] sm:$0xff] }
 0x187   :  { %661 = vmatmul.f32.gmra.mxu2 %v220_v24  ;;  %994 = vmatmul.f32.gmra.mxu1 %v211_v30 }
 0x188   :  { %1021 = vxpose.xlu0.b32.cont [12/16] (narrow) %v948_v38, 8  ;;  %1128 = vmatpush.msra.mxu2 %v1123_v19  ;;  %v1120_v19 = vld [vmem:[%s1884_s3 + $0x60] sm:$0xff] }
 0x189   :  { %774 = vmatmul.f32.gmra.mxu3 %v221_v40 }
 0x18a   :  { %v614_v47 = vpop.f32.mrf.mxu2  ;;  %1129 = vmatpush.msra.mxu2 %v1122_v60 }
 0x18b   :  { %v837_v20 = vpop.f32.mrf.mxu0  ;;  %v615_v48 = vadd.f32 %v614_v47, %v502_v33 }
 0x18c   :  { %v727_v36 = vpop.f32.mrf.mxu3  ;;  %v838_v43 = vadd.f32 %v837_v20, %v725_v23  ;;  %v950_v32 = vpop.f32.mrf.mxu1 }
 0x18d   :  { %v728_v50 = vadd.f32 %v727_v36, %v615_v48 }
 0x18e   :  { %v951_v2 = vadd.f32 %v950_v32, %v838_v43  ;;  %884 = vmatmul.f32.gmra.mxu0 %v216_v22 }
 0x18f   :  { %664 = vmatmul.f32.gmra.mxu2 %v226_v55  ;;  %997 = vmatmul.f32.gmra.mxu1 %v217_v58 }
 0x190   :  { %1022 = vxpose.xlu0.b32.cont [13/16] (narrow) %v951_v2, 8 }
 0x191   :  { %777 = vmatmul.f32.gmra.mxu3 %v227_v4 }
 0x192   :  { %v617_v34 = vpop.f32.mrf.mxu2 }
 0x193   :  { %v840_v49 = vpop.f32.mrf.mxu0  ;;  %v618_v5 = vadd.f32 %v617_v34, %v505_v52 }
 0x194   :  { %v730_v56 = vpop.f32.mrf.mxu3  ;;  %v841_v61 = vadd.f32 %v840_v49, %v728_v50  ;;  %v953_v62 = vpop.f32.mrf.mxu1 }
 0x195   :  { %v731_v10 = vadd.f32 %v730_v56, %v618_v5 }
 0x196   :  { %v954_v7 = vadd.f32 %v953_v62, %v841_v61  ;;  %887 = vmatmul.f32.gmra.mxu0 %v222_v53 }
 0x197   :  { %667 = vmatmul.f32.gmra.mxu2 %v232_v29  ;;  %1000 = vmatmul.f32.gmra.mxu1 %v223_v31  ;;  %v1121_v31 = vld [vmem:[%s1884_s3 + $0x68] sm:$0xff] }
 0x198   :  { %1023 = vxpose.xlu0.b32.cont [14/16] (narrow) %v954_v7, 8  ;;  %1130 = vmatpush.msra.mxu2 %v1121_v31 }
 0x199   :  { %780 = vmatmul.f32.gmra.mxu3 %v233_v6 }
 0x19a   :  { %v620_v15 = vpop.f32.mrf.mxu2  ;;  %1131 = vmatpush.msra.mxu2 %v1120_v19 }
 0x19b   :  { %v843_v39 = vpop.f32.mrf.mxu0  ;;  %v621_v57 = vadd.f32 %v620_v15, %v508_v9 }
 0x19c   :  { %v733_v12 = vpop.f32.mrf.mxu3  ;;  %v844_v11 = vadd.f32 %v843_v39, %v731_v10  ;;  %v956_v13 = vpop.f32.mrf.mxu1 }
 0x19d   :  { %v734_v18 = vadd.f32 %v733_v12, %v621_v57 }
 0x19e   :  { %v957_v59 = vadd.f32 %v956_v13, %v844_v11  ;;  %890 = vmatmul.f32.gmra.mxu0 %v228_v41 }
 0x19f   :  { %1003 = vmatmul.f32.gmra.mxu1 %v229_v16 }
 0x1a0   :  { %1024 = vxpose.xlu0.b32.cont [15/16] (narrow) %v957_v59, 8 }
 0x1a2   :  { %v623_v21 = vpop.f32.mrf.mxu2 }
 0x1a3   :  { %v846_v42 = vpop.f32.mrf.mxu0  ;;  %v624_v38 = vadd.f32 %v623_v21, %v511_v28 }
 0x1a4   :  { %v736_v35 = vpop.f32.mrf.mxu3  ;;  %v847_v24 = vadd.f32 %v846_v42, %v734_v18  ;;  %v959_v30 = vpop.f32.mrf.mxu1 }
 0x1a5   :  { %v737_v23 = vadd.f32 %v736_v35, %v624_v38 }
 0x1a6   :  { %v960_v40 = vadd.f32 %v959_v30, %v847_v24  ;;  %893 = vmatmul.f32.gmra.mxu0 %v234_v44 }
 0x1a7   :  { %1006 = vmatmul.f32.gmra.mxu1 %v235_v25 }
 0x1a8   :  { %1025 = vxpose.xlu0.b32.end [16/16] (narrow) %v960_v40, 8 }
 0x1aa   :  { %v626_v47 = vpop.f32.mrf.mxu2 }
 0x1ab   :  { %v849_v20 = vpop.f32.mrf.mxu0  ;;  %v627_v43 = vadd.f32 %v626_v47, %v1661_v45 }
 0x1ac   :  { %v739_v22 = vpop.f32.mrf.mxu3  ;;  %v850_v33 = vadd.f32 %v849_v20, %v737_v23  ;;  %v962_v36 = vpop.f32.mrf.mxu1 }
 0x1ad   :  { %v740_v3 = vadd.f32 %v739_v22, %v627_v43  ;;  %v1119_v22 = vld [vmem:[%s1884_s3 + $0x58] sm:$0xff] }
 0x1ae   :  { %v963_v32 = vadd.f32 %v962_v36, %v850_v33  ;;  %1132 = vmatpush.msra.mxu2 %v1119_v22 }
 0x1b0   :  { %1042 = vxpose.xlu1.b32.start [1/16] (narrow) %v963_v32, 8 }
 0x1b2   :  { %v629_v55 = vpop.f32.mrf.mxu2 }
 0x1b3   :  { %v852_v58 = vpop.f32.mrf.mxu0  ;;  %v630_v50 = vadd.f32 %v629_v55, %v1667_v54 }
 0x1b4   :  { %v742_v48 = vpop.f32.mrf.mxu3  ;;  %v853_v2 = vadd.f32 %v852_v58, %v740_v3  ;;  %v965_v4 = vpop.f32.mrf.mxu1 }
 0x1b5   :  { %v743_v49 = vadd.f32 %v742_v48, %v630_v50 }
 0x1b6   :  { %v966_v34 = vadd.f32 %v965_v4, %v853_v2 }
 0x1b8   :  { %1043 = vxpose.xlu1.b32.cont [2/16] (narrow) %v966_v34, 8 }
 0x1ba   :  { %v632_v53 = vpop.f32.mrf.mxu2 }
 0x1bb   :  { %v855_v45 = vpop.f32.mrf.mxu0  ;;  %v633_v62 = vadd.f32 %v632_v53, %v1673_v63  ;;  %v1118_v53 = vld [vmem:[%s1884_s3 + $0x50] sm:$0xff] }
 0x1bc   :  { %v745_v52 = vpop.f32.mrf.mxu3  ;;  %v856_v56 = vadd.f32 %v855_v45, %v743_v49  ;;  %v968_v61 = vpop.f32.mrf.mxu1  ;;  %1133 = vmatpush.msra.mxu2 %v1118_v53  ;;  %v1112_v53 = vld [vmem:[%s1884_s3 + $0x20] sm:$0xff] }
 0x1bd   :  { %v746_v5 = vadd.f32 %v745_v52, %v633_v62 }
 0x1be   :  { %v969_v29 = vadd.f32 %v968_v61, %v856_v56 }
 0x1c0   :  { %1044 = vxpose.xlu1.b32.cont [3/16] (narrow) %v969_v29, 8 }
 0x1c2   :  { %v635_v7 = vpop.f32.mrf.mxu2 }
 0x1c3   :  { %v858_v54 = vpop.f32.mrf.mxu0  ;;  %v636_v39 = vadd.f32 %v635_v7, %v1679_v8 }
 0x1c4   :  { %v748_v6 = vpop.f32.mrf.mxu3  ;;  %v859_v10 = vadd.f32 %v858_v54, %v746_v5  ;;  %v971_v15 = vpop.f32.mrf.mxu1 }
 0x1c5   :  { %v749_v9 = vadd.f32 %v748_v6, %v636_v39 }
 0x1c6   :  { %v972_v41 = vadd.f32 %v971_v15, %v859_v10 }
 0x1c8   :  { %1045 = vxpose.xlu1.b32.cont [4/16] (narrow) %v972_v41, 8  ;;  %v1117_v41 = vld [vmem:[%s1884_s3 + $0x48] sm:$0xff] }
 0x1c9   :  { %1134 = vmatpush.msra.mxu2 %v1117_v41 }
 0x1ca   :  { %v638_v12 = vpop.f32.mrf.mxu2 }
 0x1cb   :  { %v861_v63 = vpop.f32.mrf.mxu0  ;;  %v639_v57 = vadd.f32 %v638_v12, %v1685_v17 }
 0x1cc   :  { %v751_v11 = vpop.f32.mrf.mxu3  ;;  %v862_v13 = vadd.f32 %v861_v63, %v749_v9  ;;  %v974_v16 = vpop.f32.mrf.mxu1 }
 0x1cd   :  { %v752_v18 = vadd.f32 %v751_v11, %v639_v57 }
 0x1ce   :  { %v975_v59 = vadd.f32 %v974_v16, %v862_v13 }
 0x1d0   :  { %1046 = vxpose.xlu1.b32.cont [5/16] (narrow) %v975_v59, 8  ;;  %v1115_v59 = vld [vmem:[%s1884_s3 + $0x38] sm:$0xff] }
 0x1d2   :  { %v641_v21 = vpop.f32.mrf.mxu2 }
 0x1d3   :  { %v864_v8 = vpop.f32.mrf.mxu0  ;;  %v642_v35 = vadd.f32 %v641_v21, %v1691_v26 }
 0x1d4   :  { %v754_v42 = vpop.f32.mrf.mxu3  ;;  %v865_v44 = vadd.f32 %v864_v8, %v752_v18  ;;  %v977_v28 = vpop.f32.mrf.mxu1 }
 0x1d5   :  { %v755_v30 = vadd.f32 %v754_v42, %v642_v35  ;;  %v1824_v19 = vpop.trf.xlu0 }
 0x1d6   :  { %v978_v24 = vadd.f32 %v977_v28, %v865_v44  ;;  %v1076_v18 = vrot.slane %v1824_v19, 1 }
 0x1d8   :  { %1047 = vxpose.xlu1.b32.cont [6/16] (narrow) %v978_v24, 8  ;;  %1080 = vrot.lane.b32.xlu2 %v1076_v18, %s1319_s26 }
 0x1da   :  { %v644_v25 = vpop.f32.mrf.mxu2 }
 0x1db   :  { %v867_v17 = vpop.f32.mrf.mxu0  ;;  %v645_v47 = vadd.f32 %v644_v25, %v1697_v37 }
 0x1dc   :  { %v757_v38 = vpop.f32.mrf.mxu3  ;;  %v868_v40 = vadd.f32 %v867_v17, %v755_v30  ;;  %v980_v23 = vpop.f32.mrf.mxu1 }
 0x1dd   :  { %v758_v33 = vadd.f32 %v757_v38, %v645_v47 }
 0x1de   :  { %v981_v20 = vadd.f32 %v980_v23, %v868_v40 }
 0x1e0   :  { %1048 = vxpose.xlu1.b32.cont [7/16] (narrow) %v981_v20, 8  ;;  %v1891_v20 = vld [vmem:[#allocation9_spill] sm:$0xff] }
 0x1e2   :  { %v647_v36 = vpop.f32.mrf.mxu2 }
 0x1e3   :  { %v870_v26 = vpop.f32.mrf.mxu0  ;;  %v648_v3 = vadd.f32 %v647_v36, %v1703_v51 }
 0x1e4   :  { %v760_v43 = vpop.f32.mrf.mxu3  ;;  %v871_v32 = vadd.f32 %v870_v26, %v758_v33  ;;  %v983_v60 = vpop.f32.mrf.mxu1 }
 0x1e5   :  { %v761_v58 = vadd.f32 %v760_v43, %v648_v3  ;;  %v1892_v3 = vld [vmem:[#allocation10_spill] sm:$0xff] }
 0x1e6   :  { %v984_v55 = vadd.f32 %v983_v60, %v871_v32 }
 0x1e8   :  { %1049 = vxpose.xlu1.b32.cont [8/16] (narrow) %v984_v55, 8 }
 0x1ea   :  { %v650_v48 = vpop.f32.mrf.mxu2 }
 0x1eb   :  { %v873_v37 = vpop.f32.mrf.mxu0  ;;  %v651_v34 = vadd.f32 %v650_v48, %v1709_v0 }
 0x1ec   :  { %v763_v2 = vpop.f32.mrf.mxu3  ;;  %v874_v4 = vadd.f32 %v873_v37, %v761_v58  ;;  %v986_v50 = vpop.f32.mrf.mxu1 }
 0x1ed   :  { %v764_v45 = vadd.f32 %v763_v2, %v651_v34  ;;  %v1113_v34 = vld [vmem:[%s1884_s3 + $0x28] sm:$0xff] }
 0x1ee   :  { %v987_v49 = vadd.f32 %v986_v50, %v874_v4 }
 0x1f0   :  { %1050 = vxpose.xlu1.b32.cont [9/16] (narrow) %v987_v49, 8  ;;  %v1170_v49 = vld [vmem:[%s1886_s5 + $0x18] sm:$0xff] }
 0x1f1   :  { %1191 = vmatpush.msra.mxu3 %v1170_v49 }
 0x1f2   :  { %v653_v52 = vpop.f32.mrf.mxu2 }
 0x1f3   :  { %v876_v51 = vpop.f32.mrf.mxu0  ;;  %v654_v29 = vadd.f32 %v653_v52, %v1715_v14  ;;  %v1169_v52 = vld [vmem:[%s1886_s5 + $0x10] sm:$0xff] }
 0x1f4   :  { %v766_v56 = vpop.f32.mrf.mxu3  ;;  %v877_v61 = vadd.f32 %v876_v51, %v764_v45  ;;  %v989_v62 = vpop.f32.mrf.mxu1  ;;  %v1111_v45 = vld [vmem:[%s1884_s3 + $0x18] sm:$0xff]  ;;  %1192 = vmatpush.msra.mxu3 %v1169_v52  ;;  %v1110_v51 = vld [vmem:[%s1884_s3 + $0x10] sm:$0xff] }
 0x1f5   :  { %v767_v5 = vadd.f32 %v766_v56, %v654_v29  ;;  %v1109_v56 = vld [vmem:[%s1884_s3 + $0x8] sm:$0xff] }
 0x1f6   :  { %v990_v31 = vadd.f32 %v989_v62, %v877_v61  ;;  %v1108_v61 = vld [vmem:[%s1884_s3] sm:$0xff] }
 0x1f8   :  { %1051 = vxpose.xlu1.b32.cont [10/16] (narrow) %v990_v31, 8  ;;  %v1168_v31 = vld [vmem:[%s1886_s5 + $0x8] sm:$0xff] }
 0x1f9   :  { %1193 = vmatpush.msra.mxu3 %v1168_v31 }
 0x1fa   :  { %v656_v7 = vpop.f32.mrf.mxu2 }
 0x1fb   :  { %v879_v0 = vpop.f32.mrf.mxu0  ;;  %v657_v15 = vadd.f32 %v656_v7, %v1721_v27  ;;  %v1116_v27 = vld [vmem:[%s1884_s3 + $0x40] sm:$0xff] }
 0x1fc   :  { %v769_v54 = vpop.f32.mrf.mxu3  ;;  %v880_v6 = vadd.f32 %v879_v0, %v767_v5  ;;  %v992_v10 = vpop.f32.mrf.mxu1  ;;  %1135 = vmatpush.msra.mxu2 %v1116_v27  ;;  %v1167_v5 = vld [vmem:[%s1886_s5] sm:$0xff]  ;;  %v1084_v0 = vlaneseq }
 0x1fd   :  { %v770_v9 = vadd.f32 %v769_v54, %v657_v15  ;;  %1194 = vmatpush.msra.mxu3 %v1167_v5 }
 0x1fe   :  { %v993_v39 = vadd.f32 %v992_v10, %v880_v6  ;;  %1136 = vmatpush.msra.mxu2 %v1115_v59  ;;  %v1085_v54 = vand.u32 127, %v1084_v0  ;;  %v1092_v10 = vstv %s1882_s1 }
 0x200   :  { %1052 = vxpose.xlu1.b32.cont [11/16] (narrow) %v993_v39, 8  ;;  %vm1086_vm0 = vcmp.lt.s32.totalorder %v1085_v54, 127 }
 0x202   :  { %v659_v12 = vpop.f32.mrf.mxu2 }
 0x203   :  { %v882_v14 = vpop.f32.mrf.mxu0  ;;  %v660_v16 = vadd.f32 %v659_v12, %v1727_v46  ;;  %v1114_v46 = vld [vmem:[%s1884_s3 + $0x30] sm:$0xff]  ;;  %v1320_v12 = vmov 1935823168  }
 0x204   :  { %v772_v63 = vpop.f32.mrf.mxu3  ;;  %v883_v11 = vadd.f32 %v882_v14, %v770_v9  ;;  %v995_v13 = vpop.f32.mrf.mxu1  ;;  %1137 = vmatpush.msra.mxu2 %v1114_v46  ;;  %v1104_v14 = vunpack.c.l.s4 %v1320_v12 }
 0x205   :  { %v773_v21 = vadd.f32 %v772_v63, %v660_v16 }
 0x206   :  { %v996_v57 = vadd.f32 %v995_v13, %v883_v11  ;;  %1138 = vmatpush.msra.mxu2 %v1113_v34  ;;  %v1105_v16 = vunpack.c.0.s8 %v1104_v14 }
 0x208   :  { %1053 = vxpose.xlu1.b32.cont [12/16] (narrow) %v996_v57, 8  ;;  %1139 = vmatpush.msra.mxu2 %v1112_v53 }
 0x20a   :  { %v662_v8 = vpop.f32.mrf.mxu2  ;;  %1140 = vmatpush.msra.mxu2 %v1111_v45 }
 0x20b   :  { %v885_v42 = vpop.f32.mrf.mxu0  ;;  %v663_v24 = vadd.f32 %v662_v8, %v1733_v1 }
 0x20c   :  { %v775_v44 = vpop.f32.mrf.mxu3  ;;  %v886_v28 = vadd.f32 %v885_v42, %v773_v21  ;;  %v998_v35 = vpop.f32.mrf.mxu1  ;;  %1141 = vmatpush.msra.mxu2 %v1110_v51  ;;  %v1258_v21 = vld [vmem:[%s1885_s4] ss:$0 sm:$0xff] }
 0x20d   :  { %v776_v25 = vadd.f32 %v775_v44, %v663_v24 }
 0x20e   :  { %v999_v30 = vadd.f32 %v998_v35, %v886_v28  ;;  %1142 = vmatpush.msra.mxu2 %v1109_v56 }
 0x210   :  { %1054 = vxpose.xlu1.b32.cont [13/16] (narrow) %v999_v30, 8  ;;  %1143 = vmatpush.msra.mxu2 %v1108_v61 }
 0x212   :  { %v665_v17 = vpop.f32.mrf.mxu2 }
 0x213   :  { %v888_v38 = vpop.f32.mrf.mxu0  ;;  %v666_v22 = vadd.f32 %v665_v17, %v1891_v20 }
 0x214   :  { %v889_v40 = vadd.f32 %v888_v38, %v776_v25  ;;  %v1001_v23 = vpop.f32.mrf.mxu1  ;;  %v778_v47 = vpop.f32.mrf.mxu3 }
 0x215   :  { %v779_v36 = vadd.f32 %v778_v47, %v666_v22  ;;  %v1259_v22 = vld [vmem:[%s1887_s6] ss:$0 sm:$0xff] }
 0x216   :  { %v1002_v33 = vadd.f32 %v1001_v23, %v889_v40 }
 0x218   :  { %1055 = vxpose.xlu1.b32.cont [14/16] (narrow) %v1002_v33, 8 }
 0x21a   :  { %v668_v26 = vpop.f32.mrf.mxu2 }
 0x21b   :  { %v891_v43 = vpop.f32.mrf.mxu0  ;;  %v669_v55 = vadd.f32 %v668_v26, %v1892_v3 }
 0x21c   :  { %v892_v32 = vadd.f32 %v891_v43, %v779_v36  ;;  %v1004_v60 = vpop.f32.mrf.mxu1  ;;  %v781_v58 = vpop.f32.mrf.mxu3 }
 0x21d   :  { %v782_v48 = vadd.f32 %v781_v58, %v669_v55 }
 0x21e   :  { %v1005_v1 = vadd.f32 %v1004_v60, %v892_v32 }
 0x220   :  { %1056 = vxpose.xlu1.b32.cont [15/16] (narrow) %v1005_v1, 8 }
 0x223   :  { %v894_v37 = vpop.f32.mrf.mxu0 }
 0x224   :  { %v895_v2 = vadd.f32 %v894_v37, %v782_v48  ;;  %v1007_v4 = vpop.f32.mrf.mxu1 }
 0x226   :  { %v1008_v50 = vadd.f32 %v1007_v4, %v895_v2 }
 0x228   :  { %1057 = vxpose.xlu1.b32.end [16/16] (narrow) %v1008_v50, 8 }
 0x232   :  { %v1081_v7 = vpop.permute.xlu2 %1080 }
 0x254   :  { %v1058_v62 = vpop.trf.xlu1 }
 0x255   :  { %v1077_v29 = vrot.slane %v1058_v62, 1 }
 0x257   :  { %1082 = vrot.lane.b32.xlu2 %v1077_v29, %s1319_s26 }
 0x2b1   :  { %v1083_v6 = vpop.permute.xlu2 %1082 }
 0x2b2   :  { %v1087_v15 = vsel %vm1086_vm0, %v1081_v7, %v1083_v6  ;;  %v1088_v39 = vsel %vm1086_vm0, %v1083_v6, %v1081_v7 }
 0x2b3   :  { %v1089_v41 = vadd.f32 %v1087_v15, %v1824_v19  ;;  %v1090_v9 = vadd.f32 %v1088_v39, %v1058_v62 }
 0x2b5   :  { %v1093_v63 = vadd.f32 %v1092_v10, %v1089_v41  ;;  %v1094_v11 = vadd.f32 %v1092_v10, %v1090_v9 }
 0x2b7   :  { %v1096_v13 = vmax.f32 %v1094_v11, 0.0  ;;  %v1095_v57 = vmax.f32 %v1093_v63, 0.0 }
 0x2b9   :  { %v1099_v27 = vrot.slane %v1096_v13, 4 }
 0x2bb   :  { %v1101_v59 = vsel %vm1100_vm1, %v1095_v57, %v1099_v27 }
 0x2bc   :  { %v1106_v18 = vperm.slane %v1101_v59, %v1105_v16 }
 0x2be   :  { %1218 = vmatmul.msk.f32.vlgmr.msra.gmra.mxu2 %vm1086_vm0, %v1106_v18 }
 0x341   :  { %v1145_v8 = vpop.f32.mrf.mxu2 }
 0x342   :  { %v1146_v19 = vadd.f32 %v1258_v21, %v1145_v8 }
 0x344   :  { %v1148_v46 = vsub.f32 0.0, %v1146_v19 }
 0x346   :  { %v1149_v42 = vmul.f32 1.442695, %v1148_v46 }
 0x348   :  { %1260 = vpow2.f32 %v1149_v42 }
 0x34e   :  { %v1261_v44 = vpop.eup %1260 }
 0x34f   :  { %v1151_v28 = vadd.f32 1.0, %v1261_v44 }
 0x351   :  { %1262 = vrcp.f32 %v1151_v28  ;;  %v1163_v25 = vand.u32 2147483648, %v1151_v28  ;;  %v1161_v38 = vand.u32 2147483647, %v1151_v28  ;;  %vm1157_vm3 = vweird.f32 %v1151_v28 }
 0x353   :  { %v1164_v23 = vor.u32 1.1754944e-38, %v1163_v25  ;;  %vm1162_vm6 = vcmp.eq.f32.partialorder %v1161_v38, 8.507059e+37 }
 0x357   :  { %v1263_v35 = vpop.eup %1262 }
 0x358   :  { %v1153_v24 = vmul.f32 %v1263_v35, %v1151_v28  ;;  %vm1158_vm2 = vweird.f32 %v1263_v35 }
 0x359   :  { %vm1159_vm4 = vmor %vm1157_vm3, %vm1158_vm2 }
 0x35a   :  { %v1154_v30 = vsub.f32 1.0, %v1153_v24 }
 0x35c   :  { %v1155_v17 = vmul.f32 %v1263_v35, %v1154_v30 }
 0x35e   :  { %v1156_v40 = vadd.f32 %v1263_v35, %v1155_v17 }
 0x360   :  { %v1160_v47 = vsel %vm1159_vm4, %v1263_v35, %v1156_v40 }
 0x361   :  { %v1165_v20 = vsel %vm1162_vm6, %v1164_v23, %v1160_v47 }
 0x362   :  { %1219 = vmatmul.msk.f32.vlgmr.msra.gmra.mxu3 %vm1175_vm5, %v1165_v20 }
 0x3e5   :  { %v1196_v33 = vpop.f32.mrf.mxu3 }
 0x3e6   :  { %v1197_v36 = vadd.f32 %v1259_v22, %v1196_v33 }
 0x3e8   :  { %1200 = vst.msk [vmem:[#allocation6] sm:$0x3] %vm1199_vm7, %v1197_v36 }
 0x3e9   :  { %1211 = dma.vmem_to_hbm [thread:$0]  %s1207_s25, 32, %s1209_s28, [#allocation5]  }
 0x3ea   :  { %1314 = dma.done.wait [#allocation5], 32  }
 0x3eb   :  { %1315 = vsyncadd [#allocation5], 4294967264 }
 0x3ec   :  { %1216 = vsyncpa [#allocation4], 1 }
 0x3ed   :  { %1217 = vsyncpa [#allocation5], 1 }

</bundles_post_ra>
